<compile_context>
chip_gen: v5e
topology: v5e:2x2
jax: 0.10.0
libtpu: 0.0.40
codegen_flags: <defaults>
</compile_context>

<pallas_src>
import jax
import jax.numpy as jnp
import numpy as np
from jax import lax
from jax.experimental import pallas as pl
from jax.experimental.pallas import tpu as pltpu

# --- static problem sizes (small, consistent with the module) ---
B = 2          # batch
C = 4          # in_channels
T = 16         # sequence length
K = 3          # conv kernel size
DIL = 1        # dilation
PAD = DIL * (K - 1) // 2       # per-side "same" padding
R = B * C      # rows of the flattened (B*C, T) activation tile
C2 = 2 * C     # conv2 input channels

# packed-parameter offsets inside the single 1-D SMEM operand
W1_OFF = 0                      # w1: (c_out, tap, c_in) flattened -> 48 floats
B1_OFF = W1_OFF + C * K * C     # b1: (C,)                         -> 4
W2_OFF = B1_OFF + C             # w2: (c_out, tap, 2C c_in)        -> 96
B2_OFF = W2_OFF + C * K * C2    # b2: (C,)                         -> 4
P_LEN = B2_OFF + C              # 152 floats (~1 KiB padded in SMEM)

assert K == 3 and DIL == 1, "kernel is specialized to kernel_size=3, dilation=1"
assert T >= 2, "reflect padding requires T >= 2"


def _elu(x):
    # nn.ELU(alpha=1.0): x if x > 0 else exp(x) - 1 (min keeps dead branch finite).
    return jnp.where(x > 0, x, jnp.exp(jnp.minimum(x, 0.0)) - 1.0)


def _taps(v):
    """k=3 reflect-padded taps (v[t-1], v[t], v[t+1]) along the time/lane axis.

    Reflect boundaries: prev[0] = v[1], next[T-1] = v[T-2].  Built as two-piece lane
    concats of static slices on the full (R, T) tile (robust Mosaic lowering).
    """
    prev = jnp.concatenate([v[:, 1:2], v[:, :T - 1]], axis=1)
    nxt = jnp.concatenate([v[:, 1:], v[:, T - 2:T - 1]], axis=1)
    return prev, v, nxt


def _tree_sum(terms):
    """Balanced pairwise reduction -> short dependency chains for the VLIW scheduler."""
    terms = list(terms)
    while len(terms) > 1:
        nxt = [terms[i] + terms[i + 1] for i in range(0, len(terms) - 1, 2)]
        if len(terms) % 2:
            nxt.append(terms[-1])
        terms = nxt
    return terms[0]


def dense_block_kernel(x_ref, p_ref, o_ref):
    """Single invocation (no grid).

    x_ref: (B*C, T) VMEM  - activations; row r = batch (r // C), channel (r % C)
    p_ref: (P_LEN,) SMEM  - packed [w1 | b1 | w2 | b2], weights laid out (c_out, tap, c_in)
    o_ref: (B*C, T) VMEM  - aliased with x_ref (written once, at the very end)
    """
    x = x_ref[...]                                           # one (8, 16) vector load

    # Scalar parameters from SMEM, loaded once and reused across batch & rows.
    w1 = [p_ref[W1_OFF + i] for i in range(C * K * C)]
    b1 = [p_ref[B1_OFF + i] for i in range(C)]
    w2 = [p_ref[W2_OFF + i] for i in range(C * K * C2)]
    b2 = [p_ref[B2_OFF + i] for i in range(C)]

    def conv_rows(srcs, w, b, cin):
        """Conv1D output rows via scalar(SMEM) x row(vreg) FMAs.

        srcs[k][bb*cin + ci] : (1, T) tap-k source row for input channel ci of batch bb.
        w[(c_out*K + k)*cin + ci] : scalar weight.  Returns R rows (bias included).
        Each row = K independent per-tap partial sums, tree-combined with the bias.
        """
        rows = []
        for bb in range(B):
            for co in range(C):
                parts = [
                    _tree_sum([w[(co * K + k) * cin + ci] * srcs[k][bb * cin + ci]
                               for ci in range(cin)])
                    for k in range(K)
                ]
                rows.append(_tree_sum(parts + [b[co]]))
        return rows

    # ---- res1: Conv1D(C -> C, k=3, reflect-same) + ELU ----
    x_taps = _taps(x)
    xrows = [[t[r:r + 1, :] for r in range(R)] for t in x_taps]       # xrows[k][b*C + c]
    y1 = _elu(jnp.concatenate(conv_rows(xrows, w1, b1, C), axis=0))   # (R, T)

    # ---- res2: Conv1D(2C -> C, k=3) on concat([x, y1], channel) + ELU ----
    y1_taps = _taps(y1)
    yrows = [[t[r:r + 1, :] for r in range(R)] for t in y1_taps]
    cat_rows = [
        [xrows[k][bb * C + ci] if ci < C else yrows[k][bb * C + (ci - C)]
         for bb in range(B) for ci in range(C2)]
        for k in range(K)
    ]
    y2 = _elu(jnp.concatenate(conv_rows(cat_rows, w2, b2, C2), axis=0))

    # ---- dense residual: out = 0.2 * y2 + x  (single store; all reads of x are done) ----
    o_ref[...] = (0.2 * y2 + x).astype(o_ref.dtype)


@jax.jit
def dense_block(x, w1, b1, w2, b2):
    """x: (B, C, T) PyTorch NCL.  w1: (C, C, K), b1: (C,), w2: (C, 2C, K), b2: (C,)
    in PyTorch Conv1d (out, in, kernel) layout.  Returns (B, C, T)."""
    x_flat = x.astype(jnp.float32).reshape(R, T)             # free row-major reshape
    # One-time parameter re-layout (152 floats) into a single SMEM-resident vector;
    # in production this is folded once at weight-load time.
    params = jnp.concatenate([
        jnp.transpose(w1, (0, 2, 1)).reshape(-1),             # (c_out, tap, c_in)
        b1.reshape(-1),
        jnp.transpose(w2, (0, 2, 1)).reshape(-1),             # (c_out, tap, 2C c_in)
        b2.reshape(-1),
    ]).astype(jnp.float32)                                    # (P_LEN,)

    out_flat = pl.pallas_call(
        dense_block_kernel,
        out_shape=jax.ShapeDtypeStruct((R, T), jnp.float32),
        in_specs=[
            pl.BlockSpec(memory_space=pltpu.MemorySpace.VMEM),   # activations (1 tile)
            pl.BlockSpec(memory_space=pltpu.MemorySpace.SMEM),   # packed scalar params
        ],
        out_specs=pl.BlockSpec(memory_space=pltpu.MemorySpace.VMEM),
        input_output_aliases={0: 0},   # safe: x fully read before the single store
    )(x_flat, params)
    return out_flat.reshape(B, C, T)


# ---------------- pure-JAX reference (for correctness check) ----------------
def _conv1d_ref(x, w_oik, b):
    # x: (B, Cin, T); w_oik: (Cout, Cin, K) torch layout; reflect "same" padding.
    xp = jnp.pad(x, ((0, 0), (0, 0), (PAD, PAD)), mode='reflect')
    y = lax.conv_general_dilated(
        xp, w_oik, window_strides=(1,), padding='VALID',
        rhs_dilation=(DIL,), dimension_numbers=('NCH', 'OIH', 'NCH'),
        precision=lax.Precision.HIGHEST)
    return y + b.reshape(1, -1, 1)


def dense_block_ref(x, w1, b1, w2, b2):
    y1 = _elu(_conv1d_ref(x, w1, b1))
    cat = jnp.concatenate([x, y1], axis=1)
    y2 = _elu(_conv1d_ref(cat, w2, b2))
    return 0.2 * y2 + x


if __name__ == "__main__":
    key = jax.random.PRNGKey(0)
    kx, k1, k2, k3, k4 = jax.random.split(key, 5)

    # deterministic synthetic parameters (weight-norm folded into dense weights)
    x = jax.random.normal(kx, (B, C, T), dtype=jnp.float32)               # PyTorch NCL
    w1 = 0.2 * jax.random.normal(k1, (C, C, K), dtype=jnp.float32)        # (O, I, K)
    b1 = 0.1 * jax.random.normal(k2, (C,), dtype=jnp.float32)
    w2 = 0.2 * jax.random.normal(k3, (C, 2 * C, K), dtype=jnp.float32)    # (O, 2C, K)
    b2 = 0.1 * jax.random.normal(k4, (C,), dtype=jnp.float32)

    out = jax.block_until_ready(dense_block(x, w1, b1, w2, b2))
    ref = jax.block_until_ready(dense_block_ref(x, w1, b1, w2, b2))

    np.testing.assert_allclose(np.asarray(out), np.asarray(ref),
                               rtol=1e-4, atol=1e-5)
    print("KERNEL_OK")
</pallas_src>

<mosaic_0001>
module attributes {stable_mosaic.version = 11 : i64} {
  func.func @dense_block_kernel(%arg0: memref<8x16xf32, #tpu.memory_space<vmem>>, %arg1: memref<152xf32, #tpu.memory_space<smem>>, %arg2: memref<8x16xf32, #tpu.memory_space<vmem>>) attributes {dimension_semantics = [], scalar_prefetch = 0 : i64, scratch_operands = 0 : i64, tpu.core_type = #tpu.core_type<tc>} {
    %c0 = arith.constant 0 : index
    %c0_0 = arith.constant 0 : index
    %0 = vector.load %arg0[%c0, %c0_0] : memref<8x16xf32, #tpu.memory_space<vmem>>, vector<8x16xf32>
    %c0_1 = arith.constant 0 : index
    %1 = memref.load %arg1[%c0_1] : memref<152xf32, #tpu.memory_space<smem>>
    %c1 = arith.constant 1 : index
    %2 = memref.load %arg1[%c1] : memref<152xf32, #tpu.memory_space<smem>>
    %c2 = arith.constant 2 : index
    %3 = memref.load %arg1[%c2] : memref<152xf32, #tpu.memory_space<smem>>
    %c3 = arith.constant 3 : index
    %4 = memref.load %arg1[%c3] : memref<152xf32, #tpu.memory_space<smem>>
    %c4 = arith.constant 4 : index
    %5 = memref.load %arg1[%c4] : memref<152xf32, #tpu.memory_space<smem>>
    %c5 = arith.constant 5 : index
    %6 = memref.load %arg1[%c5] : memref<152xf32, #tpu.memory_space<smem>>
    %c6 = arith.constant 6 : index
    %7 = memref.load %arg1[%c6] : memref<152xf32, #tpu.memory_space<smem>>
    %c7 = arith.constant 7 : index
    %8 = memref.load %arg1[%c7] : memref<152xf32, #tpu.memory_space<smem>>
    %c8 = arith.constant 8 : index
    %9 = memref.load %arg1[%c8] : memref<152xf32, #tpu.memory_space<smem>>
    %c9 = arith.constant 9 : index
    %10 = memref.load %arg1[%c9] : memref<152xf32, #tpu.memory_space<smem>>
    %c10 = arith.constant 10 : index
    %11 = memref.load %arg1[%c10] : memref<152xf32, #tpu.memory_space<smem>>
    %c11 = arith.constant 11 : index
    %12 = memref.load %arg1[%c11] : memref<152xf32, #tpu.memory_space<smem>>
    %c12 = arith.constant 12 : index
    %13 = memref.load %arg1[%c12] : memref<152xf32, #tpu.memory_space<smem>>
    %c13 = arith.constant 13 : index
    %14 = memref.load %arg1[%c13] : memref<152xf32, #tpu.memory_space<smem>>
    %c14 = arith.constant 14 : index
    %15 = memref.load %arg1[%c14] : memref<152xf32, #tpu.memory_space<smem>>
    %c15 = arith.constant 15 : index
    %16 = memref.load %arg1[%c15] : memref<152xf32, #tpu.memory_space<smem>>
    %c16 = arith.constant 16 : index
    %17 = memref.load %arg1[%c16] : memref<152xf32, #tpu.memory_space<smem>>
    %c17 = arith.constant 17 : index
    %18 = memref.load %arg1[%c17] : memref<152xf32, #tpu.memory_space<smem>>
    %c18 = arith.constant 18 : index
    %19 = memref.load %arg1[%c18] : memref<152xf32, #tpu.memory_space<smem>>
    %c19 = arith.constant 19 : index
    %20 = memref.load %arg1[%c19] : memref<152xf32, #tpu.memory_space<smem>>
    %c20 = arith.constant 20 : index
    %21 = memref.load %arg1[%c20] : memref<152xf32, #tpu.memory_space<smem>>
    %c21 = arith.constant 21 : index
    %22 = memref.load %arg1[%c21] : memref<152xf32, #tpu.memory_space<smem>>
    %c22 = arith.constant 22 : index
    %23 = memref.load %arg1[%c22] : memref<152xf32, #tpu.memory_space<smem>>
    %c23 = arith.constant 23 : index
    %24 = memref.load %arg1[%c23] : memref<152xf32, #tpu.memory_space<smem>>
    %c24 = arith.constant 24 : index
    %25 = memref.load %arg1[%c24] : memref<152xf32, #tpu.memory_space<smem>>
    %c25 = arith.constant 25 : index
    %26 = memref.load %arg1[%c25] : memref<152xf32, #tpu.memory_space<smem>>
    %c26 = arith.constant 26 : index
    %27 = memref.load %arg1[%c26] : memref<152xf32, #tpu.memory_space<smem>>
    %c27 = arith.constant 27 : index
    %28 = memref.load %arg1[%c27] : memref<152xf32, #tpu.memory_space<smem>>
    %c28 = arith.constant 28 : index
    %29 = memref.load %arg1[%c28] : memref<152xf32, #tpu.memory_space<smem>>
    %c29 = arith.constant 29 : index
    %30 = memref.load %arg1[%c29] : memref<152xf32, #tpu.memory_space<smem>>
    %c30 = arith.constant 30 : index
    %31 = memref.load %arg1[%c30] : memref<152xf32, #tpu.memory_space<smem>>
    %c31 = arith.constant 31 : index
    %32 = memref.load %arg1[%c31] : memref<152xf32, #tpu.memory_space<smem>>
    %c32 = arith.constant 32 : index
    %33 = memref.load %arg1[%c32] : memref<152xf32, #tpu.memory_space<smem>>
    %c33 = arith.constant 33 : index
    %34 = memref.load %arg1[%c33] : memref<152xf32, #tpu.memory_space<smem>>
    %c34 = arith.constant 34 : index
    %35 = memref.load %arg1[%c34] : memref<152xf32, #tpu.memory_space<smem>>
    %c35 = arith.constant 35 : index
    %36 = memref.load %arg1[%c35] : memref<152xf32, #tpu.memory_space<smem>>
    %c36 = arith.constant 36 : index
    %37 = memref.load %arg1[%c36] : memref<152xf32, #tpu.memory_space<smem>>
    %c37 = arith.constant 37 : index
    %38 = memref.load %arg1[%c37] : memref<152xf32, #tpu.memory_space<smem>>
    %c38 = arith.constant 38 : index
    %39 = memref.load %arg1[%c38] : memref<152xf32, #tpu.memory_space<smem>>
    %c39 = arith.constant 39 : index
    %40 = memref.load %arg1[%c39] : memref<152xf32, #tpu.memory_space<smem>>
    %c40 = arith.constant 40 : index
    %41 = memref.load %arg1[%c40] : memref<152xf32, #tpu.memory_space<smem>>
    %c41 = arith.constant 41 : index
    %42 = memref.load %arg1[%c41] : memref<152xf32, #tpu.memory_space<smem>>
    %c42 = arith.constant 42 : index
    %43 = memref.load %arg1[%c42] : memref<152xf32, #tpu.memory_space<smem>>
    %c43 = arith.constant 43 : index
    %44 = memref.load %arg1[%c43] : memref<152xf32, #tpu.memory_space<smem>>
    %c44 = arith.constant 44 : index
    %45 = memref.load %arg1[%c44] : memref<152xf32, #tpu.memory_space<smem>>
    %c45 = arith.constant 45 : index
    %46 = memref.load %arg1[%c45] : memref<152xf32, #tpu.memory_space<smem>>
    %c46 = arith.constant 46 : index
    %47 = memref.load %arg1[%c46] : memref<152xf32, #tpu.memory_space<smem>>
    %c47 = arith.constant 47 : index
    %48 = memref.load %arg1[%c47] : memref<152xf32, #tpu.memory_space<smem>>
    %c48 = arith.constant 48 : index
    %49 = memref.load %arg1[%c48] : memref<152xf32, #tpu.memory_space<smem>>
    %c49 = arith.constant 49 : index
    %50 = memref.load %arg1[%c49] : memref<152xf32, #tpu.memory_space<smem>>
    %c50 = arith.constant 50 : index
    %51 = memref.load %arg1[%c50] : memref<152xf32, #tpu.memory_space<smem>>
    %c51 = arith.constant 51 : index
    %52 = memref.load %arg1[%c51] : memref<152xf32, #tpu.memory_space<smem>>
    %c52 = arith.constant 52 : index
    %53 = memref.load %arg1[%c52] : memref<152xf32, #tpu.memory_space<smem>>
    %c53 = arith.constant 53 : index
    %54 = memref.load %arg1[%c53] : memref<152xf32, #tpu.memory_space<smem>>
    %c54 = arith.constant 54 : index
    %55 = memref.load %arg1[%c54] : memref<152xf32, #tpu.memory_space<smem>>
    %c55 = arith.constant 55 : index
    %56 = memref.load %arg1[%c55] : memref<152xf32, #tpu.memory_space<smem>>
    %c56 = arith.constant 56 : index
    %57 = memref.load %arg1[%c56] : memref<152xf32, #tpu.memory_space<smem>>
    %c57 = arith.constant 57 : index
    %58 = memref.load %arg1[%c57] : memref<152xf32, #tpu.memory_space<smem>>
    %c58 = arith.constant 58 : index
    %59 = memref.load %arg1[%c58] : memref<152xf32, #tpu.memory_space<smem>>
    %c59 = arith.constant 59 : index
    %60 = memref.load %arg1[%c59] : memref<152xf32, #tpu.memory_space<smem>>
    %c60 = arith.constant 60 : index
    %61 = memref.load %arg1[%c60] : memref<152xf32, #tpu.memory_space<smem>>
    %c61 = arith.constant 61 : index
    %62 = memref.load %arg1[%c61] : memref<152xf32, #tpu.memory_space<smem>>
    %c62 = arith.constant 62 : index
    %63 = memref.load %arg1[%c62] : memref<152xf32, #tpu.memory_space<smem>>
    %c63 = arith.constant 63 : index
    %64 = memref.load %arg1[%c63] : memref<152xf32, #tpu.memory_space<smem>>
    %c64 = arith.constant 64 : index
    %65 = memref.load %arg1[%c64] : memref<152xf32, #tpu.memory_space<smem>>
    %c65 = arith.constant 65 : index
    %66 = memref.load %arg1[%c65] : memref<152xf32, #tpu.memory_space<smem>>
    %c66 = arith.constant 66 : index
    %67 = memref.load %arg1[%c66] : memref<152xf32, #tpu.memory_space<smem>>
    %c67 = arith.constant 67 : index
    %68 = memref.load %arg1[%c67] : memref<152xf32, #tpu.memory_space<smem>>
    %c68 = arith.constant 68 : index
    %69 = memref.load %arg1[%c68] : memref<152xf32, #tpu.memory_space<smem>>
    %c69 = arith.constant 69 : index
    %70 = memref.load %arg1[%c69] : memref<152xf32, #tpu.memory_space<smem>>
    %c70 = arith.constant 70 : index
    %71 = memref.load %arg1[%c70] : memref<152xf32, #tpu.memory_space<smem>>
    %c71 = arith.constant 71 : index
    %72 = memref.load %arg1[%c71] : memref<152xf32, #tpu.memory_space<smem>>
    %c72 = arith.constant 72 : index
    %73 = memref.load %arg1[%c72] : memref<152xf32, #tpu.memory_space<smem>>
    %c73 = arith.constant 73 : index
    %74 = memref.load %arg1[%c73] : memref<152xf32, #tpu.memory_space<smem>>
    %c74 = arith.constant 74 : index
    %75 = memref.load %arg1[%c74] : memref<152xf32, #tpu.memory_space<smem>>
    %c75 = arith.constant 75 : index
    %76 = memref.load %arg1[%c75] : memref<152xf32, #tpu.memory_space<smem>>
    %c76 = arith.constant 76 : index
    %77 = memref.load %arg1[%c76] : memref<152xf32, #tpu.memory_space<smem>>
    %c77 = arith.constant 77 : index
    %78 = memref.load %arg1[%c77] : memref<152xf32, #tpu.memory_space<smem>>
    %c78 = arith.constant 78 : index
    %79 = memref.load %arg1[%c78] : memref<152xf32, #tpu.memory_space<smem>>
    %c79 = arith.constant 79 : index
    %80 = memref.load %arg1[%c79] : memref<152xf32, #tpu.memory_space<smem>>
    %c80 = arith.constant 80 : index
    %81 = memref.load %arg1[%c80] : memref<152xf32, #tpu.memory_space<smem>>
    %c81 = arith.constant 81 : index
    %82 = memref.load %arg1[%c81] : memref<152xf32, #tpu.memory_space<smem>>
    %c82 = arith.constant 82 : index
    %83 = memref.load %arg1[%c82] : memref<152xf32, #tpu.memory_space<smem>>
    %c83 = arith.constant 83 : index
    %84 = memref.load %arg1[%c83] : memref<152xf32, #tpu.memory_space<smem>>
    %c84 = arith.constant 84 : index
    %85 = memref.load %arg1[%c84] : memref<152xf32, #tpu.memory_space<smem>>
    %c85 = arith.constant 85 : index
    %86 = memref.load %arg1[%c85] : memref<152xf32, #tpu.memory_space<smem>>
    %c86 = arith.constant 86 : index
    %87 = memref.load %arg1[%c86] : memref<152xf32, #tpu.memory_space<smem>>
    %c87 = arith.constant 87 : index
    %88 = memref.load %arg1[%c87] : memref<152xf32, #tpu.memory_space<smem>>
    %c88 = arith.constant 88 : index
    %89 = memref.load %arg1[%c88] : memref<152xf32, #tpu.memory_space<smem>>
    %c89 = arith.constant 89 : index
    %90 = memref.load %arg1[%c89] : memref<152xf32, #tpu.memory_space<smem>>
    %c90 = arith.constant 90 : index
    %91 = memref.load %arg1[%c90] : memref<152xf32, #tpu.memory_space<smem>>
    %c91 = arith.constant 91 : index
    %92 = memref.load %arg1[%c91] : memref<152xf32, #tpu.memory_space<smem>>
    %c92 = arith.constant 92 : index
    %93 = memref.load %arg1[%c92] : memref<152xf32, #tpu.memory_space<smem>>
    %c93 = arith.constant 93 : index
    %94 = memref.load %arg1[%c93] : memref<152xf32, #tpu.memory_space<smem>>
    %c94 = arith.constant 94 : index
    %95 = memref.load %arg1[%c94] : memref<152xf32, #tpu.memory_space<smem>>
    %c95 = arith.constant 95 : index
    %96 = memref.load %arg1[%c95] : memref<152xf32, #tpu.memory_space<smem>>
    %c96 = arith.constant 96 : index
    %97 = memref.load %arg1[%c96] : memref<152xf32, #tpu.memory_space<smem>>
    %c97 = arith.constant 97 : index
    %98 = memref.load %arg1[%c97] : memref<152xf32, #tpu.memory_space<smem>>
    %c98 = arith.constant 98 : index
    %99 = memref.load %arg1[%c98] : memref<152xf32, #tpu.memory_space<smem>>
    %c99 = arith.constant 99 : index
    %100 = memref.load %arg1[%c99] : memref<152xf32, #tpu.memory_space<smem>>
    %c100 = arith.constant 100 : index
    %101 = memref.load %arg1[%c100] : memref<152xf32, #tpu.memory_space<smem>>
    %c101 = arith.constant 101 : index
    %102 = memref.load %arg1[%c101] : memref<152xf32, #tpu.memory_space<smem>>
    %c102 = arith.constant 102 : index
    %103 = memref.load %arg1[%c102] : memref<152xf32, #tpu.memory_space<smem>>
    %c103 = arith.constant 103 : index
    %104 = memref.load %arg1[%c103] : memref<152xf32, #tpu.memory_space<smem>>
    %c104 = arith.constant 104 : index
    %105 = memref.load %arg1[%c104] : memref<152xf32, #tpu.memory_space<smem>>
    %c105 = arith.constant 105 : index
    %106 = memref.load %arg1[%c105] : memref<152xf32, #tpu.memory_space<smem>>
    %c106 = arith.constant 106 : index
    %107 = memref.load %arg1[%c106] : memref<152xf32, #tpu.memory_space<smem>>
    %c107 = arith.constant 107 : index
    %108 = memref.load %arg1[%c107] : memref<152xf32, #tpu.memory_space<smem>>
    %c108 = arith.constant 108 : index
    %109 = memref.load %arg1[%c108] : memref<152xf32, #tpu.memory_space<smem>>
    %c109 = arith.constant 109 : index
    %110 = memref.load %arg1[%c109] : memref<152xf32, #tpu.memory_space<smem>>
    %c110 = arith.constant 110 : index
    %111 = memref.load %arg1[%c110] : memref<152xf32, #tpu.memory_space<smem>>
    %c111 = arith.constant 111 : index
    %112 = memref.load %arg1[%c111] : memref<152xf32, #tpu.memory_space<smem>>
    %c112 = arith.constant 112 : index
    %113 = memref.load %arg1[%c112] : memref<152xf32, #tpu.memory_space<smem>>
    %c113 = arith.constant 113 : index
    %114 = memref.load %arg1[%c113] : memref<152xf32, #tpu.memory_space<smem>>
    %c114 = arith.constant 114 : index
    %115 = memref.load %arg1[%c114] : memref<152xf32, #tpu.memory_space<smem>>
    %c115 = arith.constant 115 : index
    %116 = memref.load %arg1[%c115] : memref<152xf32, #tpu.memory_space<smem>>
    %c116 = arith.constant 116 : index
    %117 = memref.load %arg1[%c116] : memref<152xf32, #tpu.memory_space<smem>>
    %c117 = arith.constant 117 : index
    %118 = memref.load %arg1[%c117] : memref<152xf32, #tpu.memory_space<smem>>
    %c118 = arith.constant 118 : index
    %119 = memref.load %arg1[%c118] : memref<152xf32, #tpu.memory_space<smem>>
    %c119 = arith.constant 119 : index
    %120 = memref.load %arg1[%c119] : memref<152xf32, #tpu.memory_space<smem>>
    %c120 = arith.constant 120 : index
    %121 = memref.load %arg1[%c120] : memref<152xf32, #tpu.memory_space<smem>>
    %c121 = arith.constant 121 : index
    %122 = memref.load %arg1[%c121] : memref<152xf32, #tpu.memory_space<smem>>
    %c122 = arith.constant 122 : index
    %123 = memref.load %arg1[%c122] : memref<152xf32, #tpu.memory_space<smem>>
    %c123 = arith.constant 123 : index
    %124 = memref.load %arg1[%c123] : memref<152xf32, #tpu.memory_space<smem>>
    %c124 = arith.constant 124 : index
    %125 = memref.load %arg1[%c124] : memref<152xf32, #tpu.memory_space<smem>>
    %c125 = arith.constant 125 : index
    %126 = memref.load %arg1[%c125] : memref<152xf32, #tpu.memory_space<smem>>
    %c126 = arith.constant 126 : index
    %127 = memref.load %arg1[%c126] : memref<152xf32, #tpu.memory_space<smem>>
    %c127 = arith.constant 127 : index
    %128 = memref.load %arg1[%c127] : memref<152xf32, #tpu.memory_space<smem>>
    %c128 = arith.constant 128 : index
    %129 = memref.load %arg1[%c128] : memref<152xf32, #tpu.memory_space<smem>>
    %c129 = arith.constant 129 : index
    %130 = memref.load %arg1[%c129] : memref<152xf32, #tpu.memory_space<smem>>
    %c130 = arith.constant 130 : index
    %131 = memref.load %arg1[%c130] : memref<152xf32, #tpu.memory_space<smem>>
    %c131 = arith.constant 131 : index
    %132 = memref.load %arg1[%c131] : memref<152xf32, #tpu.memory_space<smem>>
    %c132 = arith.constant 132 : index
    %133 = memref.load %arg1[%c132] : memref<152xf32, #tpu.memory_space<smem>>
    %c133 = arith.constant 133 : index
    %134 = memref.load %arg1[%c133] : memref<152xf32, #tpu.memory_space<smem>>
    %c134 = arith.constant 134 : index
    %135 = memref.load %arg1[%c134] : memref<152xf32, #tpu.memory_space<smem>>
    %c135 = arith.constant 135 : index
    %136 = memref.load %arg1[%c135] : memref<152xf32, #tpu.memory_space<smem>>
    %c136 = arith.constant 136 : index
    %137 = memref.load %arg1[%c136] : memref<152xf32, #tpu.memory_space<smem>>
    %c137 = arith.constant 137 : index
    %138 = memref.load %arg1[%c137] : memref<152xf32, #tpu.memory_space<smem>>
    %c138 = arith.constant 138 : index
    %139 = memref.load %arg1[%c138] : memref<152xf32, #tpu.memory_space<smem>>
    %c139 = arith.constant 139 : index
    %140 = memref.load %arg1[%c139] : memref<152xf32, #tpu.memory_space<smem>>
    %c140 = arith.constant 140 : index
    %141 = memref.load %arg1[%c140] : memref<152xf32, #tpu.memory_space<smem>>
    %c141 = arith.constant 141 : index
    %142 = memref.load %arg1[%c141] : memref<152xf32, #tpu.memory_space<smem>>
    %c142 = arith.constant 142 : index
    %143 = memref.load %arg1[%c142] : memref<152xf32, #tpu.memory_space<smem>>
    %c143 = arith.constant 143 : index
    %144 = memref.load %arg1[%c143] : memref<152xf32, #tpu.memory_space<smem>>
    %c144 = arith.constant 144 : index
    %145 = memref.load %arg1[%c144] : memref<152xf32, #tpu.memory_space<smem>>
    %c145 = arith.constant 145 : index
    %146 = memref.load %arg1[%c145] : memref<152xf32, #tpu.memory_space<smem>>
    %c146 = arith.constant 146 : index
    %147 = memref.load %arg1[%c146] : memref<152xf32, #tpu.memory_space<smem>>
    %c147 = arith.constant 147 : index
    %148 = memref.load %arg1[%c147] : memref<152xf32, #tpu.memory_space<smem>>
    %c148 = arith.constant 148 : index
    %149 = memref.load %arg1[%c148] : memref<152xf32, #tpu.memory_space<smem>>
    %c149 = arith.constant 149 : index
    %150 = memref.load %arg1[%c149] : memref<152xf32, #tpu.memory_space<smem>>
    %c150 = arith.constant 150 : index
    %151 = memref.load %arg1[%c150] : memref<152xf32, #tpu.memory_space<smem>>
    %c151 = arith.constant 151 : index
    %152 = memref.load %arg1[%c151] : memref<152xf32, #tpu.memory_space<smem>>
    %153 = vector.extract_strided_slice %0 {offsets = [0, 1], sizes = [8, 1], strides = [1, 1]} : vector<8x16xf32> to vector<8x1xf32>
    %154 = vector.extract_strided_slice %0 {offsets = [0, 0], sizes = [8, 15], strides = [1, 1]} : vector<8x16xf32> to vector<8x15xf32>
    %155 = tpu.concatenate %153, %154 in 1 : vector<8x1xf32>, vector<8x15xf32> -> vector<8x16xf32>
    %156 = vector.extract_strided_slice %0 {offsets = [0, 1], sizes = [8, 15], strides = [1, 1]} : vector<8x16xf32> to vector<8x15xf32>
    %157 = vector.extract_strided_slice %0 {offsets = [0, 14], sizes = [8, 1], strides = [1, 1]} : vector<8x16xf32> to vector<8x1xf32>
    %158 = tpu.concatenate %156, %157 in 1 : vector<8x15xf32>, vector<8x1xf32> -> vector<8x16xf32>
    %159 = vector.extract_strided_slice %155 {offsets = [0, 0], sizes = [1, 16], strides = [1, 1]} : vector<8x16xf32> to vector<1x16xf32>
    %160 = vector.extract_strided_slice %155 {offsets = [1, 0], sizes = [1, 16], strides = [1, 1]} : vector<8x16xf32> to vector<1x16xf32>
    %161 = vector.extract_strided_slice %155 {offsets = [2, 0], sizes = [1, 16], strides = [1, 1]} : vector<8x16xf32> to vector<1x16xf32>
    %162 = vector.extract_strided_slice %155 {offsets = [3, 0], sizes = [1, 16], strides = [1, 1]} : vector<8x16xf32> to vector<1x16xf32>
    %163 = vector.extract_strided_slice %155 {offsets = [4, 0], sizes = [1, 16], strides = [1, 1]} : vector<8x16xf32> to vector<1x16xf32>
    %164 = vector.extract_strided_slice %155 {offsets = [5, 0], sizes = [1, 16], strides = [1, 1]} : vector<8x16xf32> to vector<1x16xf32>
    %165 = vector.extract_strided_slice %155 {offsets = [6, 0], sizes = [1, 16], strides = [1, 1]} : vector<8x16xf32> to vector<1x16xf32>
    %166 = vector.extract_strided_slice %155 {offsets = [7, 0], sizes = [1, 16], strides = [1, 1]} : vector<8x16xf32> to vector<1x16xf32>
    %167 = vector.extract_strided_slice %0 {offsets = [0, 0], sizes = [1, 16], strides = [1, 1]} : vector<8x16xf32> to vector<1x16xf32>
    %168 = vector.extract_strided_slice %0 {offsets = [1, 0], sizes = [1, 16], strides = [1, 1]} : vector<8x16xf32> to vector<1x16xf32>
    %169 = vector.extract_strided_slice %0 {offsets = [2, 0], sizes = [1, 16], strides = [1, 1]} : vector<8x16xf32> to vector<1x16xf32>
    %170 = vector.extract_strided_slice %0 {offsets = [3, 0], sizes = [1, 16], strides = [1, 1]} : vector<8x16xf32> to vector<1x16xf32>
    %171 = vector.extract_strided_slice %0 {offsets = [4, 0], sizes = [1, 16], strides = [1, 1]} : vector<8x16xf32> to vector<1x16xf32>
    %172 = vector.extract_strided_slice %0 {offsets = [5, 0], sizes = [1, 16], strides = [1, 1]} : vector<8x16xf32> to vector<1x16xf32>
    %173 = vector.extract_strided_slice %0 {offsets = [6, 0], sizes = [1, 16], strides = [1, 1]} : vector<8x16xf32> to vector<1x16xf32>
    %174 = vector.extract_strided_slice %0 {offsets = [7, 0], sizes = [1, 16], strides = [1, 1]} : vector<8x16xf32> to vector<1x16xf32>
    %175 = vector.extract_strided_slice %158 {offsets = [0, 0], sizes = [1, 16], strides = [1, 1]} : vector<8x16xf32> to vector<1x16xf32>
    %176 = vector.extract_strided_slice %158 {offsets = [1, 0], sizes = [1, 16], strides = [1, 1]} : vector<8x16xf32> to vector<1x16xf32>
    %177 = vector.extract_strided_slice %158 {offsets = [2, 0], sizes = [1, 16], strides = [1, 1]} : vector<8x16xf32> to vector<1x16xf32>
    %178 = vector.extract_strided_slice %158 {offsets = [3, 0], sizes = [1, 16], strides = [1, 1]} : vector<8x16xf32> to vector<1x16xf32>
    %179 = vector.extract_strided_slice %158 {offsets = [4, 0], sizes = [1, 16], strides = [1, 1]} : vector<8x16xf32> to vector<1x16xf32>
    %180 = vector.extract_strided_slice %158 {offsets = [5, 0], sizes = [1, 16], strides = [1, 1]} : vector<8x16xf32> to vector<1x16xf32>
    %181 = vector.extract_strided_slice %158 {offsets = [6, 0], sizes = [1, 16], strides = [1, 1]} : vector<8x16xf32> to vector<1x16xf32>
    %182 = vector.extract_strided_slice %158 {offsets = [7, 0], sizes = [1, 16], strides = [1, 1]} : vector<8x16xf32> to vector<1x16xf32>
    %183 = vector.broadcast %1 : f32 to vector<1x16xf32>
    %184 = arith.mulf %183, %159 : vector<1x16xf32>
    %185 = vector.broadcast %2 : f32 to vector<1x16xf32>
    %186 = arith.mulf %185, %160 : vector<1x16xf32>
    %187 = vector.broadcast %3 : f32 to vector<1x16xf32>
    %188 = arith.mulf %187, %161 : vector<1x16xf32>
    %189 = vector.broadcast %4 : f32 to vector<1x16xf32>
    %190 = arith.mulf %189, %162 : vector<1x16xf32>
    %191 = arith.addf %184, %186 : vector<1x16xf32>
    %192 = arith.addf %188, %190 : vector<1x16xf32>
    %193 = arith.addf %191, %192 : vector<1x16xf32>
    %194 = vector.broadcast %5 : f32 to vector<1x16xf32>
    %195 = arith.mulf %194, %167 : vector<1x16xf32>
    %196 = vector.broadcast %6 : f32 to vector<1x16xf32>
    %197 = arith.mulf %196, %168 : vector<1x16xf32>
    %198 = vector.broadcast %7 : f32 to vector<1x16xf32>
    %199 = arith.mulf %198, %169 : vector<1x16xf32>
    %200 = vector.broadcast %8 : f32 to vector<1x16xf32>
    %201 = arith.mulf %200, %170 : vector<1x16xf32>
    %202 = arith.addf %195, %197 : vector<1x16xf32>
    %203 = arith.addf %199, %201 : vector<1x16xf32>
    %204 = arith.addf %202, %203 : vector<1x16xf32>
    %205 = vector.broadcast %9 : f32 to vector<1x16xf32>
    %206 = arith.mulf %205, %175 : vector<1x16xf32>
    %207 = vector.broadcast %10 : f32 to vector<1x16xf32>
    %208 = arith.mulf %207, %176 : vector<1x16xf32>
    %209 = vector.broadcast %11 : f32 to vector<1x16xf32>
    %210 = arith.mulf %209, %177 : vector<1x16xf32>
    %211 = vector.broadcast %12 : f32 to vector<1x16xf32>
    %212 = arith.mulf %211, %178 : vector<1x16xf32>
    %213 = arith.addf %206, %208 : vector<1x16xf32>
    %214 = arith.addf %210, %212 : vector<1x16xf32>
    %215 = arith.addf %213, %214 : vector<1x16xf32>
    %216 = arith.addf %193, %204 : vector<1x16xf32>
    %217 = vector.broadcast %49 : f32 to vector<1x16xf32>
    %218 = arith.addf %215, %217 : vector<1x16xf32>
    %219 = arith.addf %216, %218 : vector<1x16xf32>
    %220 = vector.broadcast %13 : f32 to vector<1x16xf32>
    %221 = arith.mulf %220, %159 : vector<1x16xf32>
    %222 = vector.broadcast %14 : f32 to vector<1x16xf32>
    %223 = arith.mulf %222, %160 : vector<1x16xf32>
    %224 = vector.broadcast %15 : f32 to vector<1x16xf32>
    %225 = arith.mulf %224, %161 : vector<1x16xf32>
    %226 = vector.broadcast %16 : f32 to vector<1x16xf32>
    %227 = arith.mulf %226, %162 : vector<1x16xf32>
    %228 = arith.addf %221, %223 : vector<1x16xf32>
    %229 = arith.addf %225, %227 : vector<1x16xf32>
    %230 = arith.addf %228, %229 : vector<1x16xf32>
    %231 = vector.broadcast %17 : f32 to vector<1x16xf32>
    %232 = arith.mulf %231, %167 : vector<1x16xf32>
    %233 = vector.broadcast %18 : f32 to vector<1x16xf32>
    %234 = arith.mulf %233, %168 : vector<1x16xf32>
    %235 = vector.broadcast %19 : f32 to vector<1x16xf32>
    %236 = arith.mulf %235, %169 : vector<1x16xf32>
    %237 = vector.broadcast %20 : f32 to vector<1x16xf32>
    %238 = arith.mulf %237, %170 : vector<1x16xf32>
    %239 = arith.addf %232, %234 : vector<1x16xf32>
    %240 = arith.addf %236, %238 : vector<1x16xf32>
    %241 = arith.addf %239, %240 : vector<1x16xf32>
    %242 = vector.broadcast %21 : f32 to vector<1x16xf32>
    %243 = arith.mulf %242, %175 : vector<1x16xf32>
    %244 = vector.broadcast %22 : f32 to vector<1x16xf32>
    %245 = arith.mulf %244, %176 : vector<1x16xf32>
    %246 = vector.broadcast %23 : f32 to vector<1x16xf32>
    %247 = arith.mulf %246, %177 : vector<1x16xf32>
    %248 = vector.broadcast %24 : f32 to vector<1x16xf32>
    %249 = arith.mulf %248, %178 : vector<1x16xf32>
    %250 = arith.addf %243, %245 : vector<1x16xf32>
    %251 = arith.addf %247, %249 : vector<1x16xf32>
    %252 = arith.addf %250, %251 : vector<1x16xf32>
    %253 = arith.addf %230, %241 : vector<1x16xf32>
    %254 = vector.broadcast %50 : f32 to vector<1x16xf32>
    %255 = arith.addf %252, %254 : vector<1x16xf32>
    %256 = arith.addf %253, %255 : vector<1x16xf32>
    %257 = vector.broadcast %25 : f32 to vector<1x16xf32>
    %258 = arith.mulf %257, %159 : vector<1x16xf32>
    %259 = vector.broadcast %26 : f32 to vector<1x16xf32>
    %260 = arith.mulf %259, %160 : vector<1x16xf32>
    %261 = vector.broadcast %27 : f32 to vector<1x16xf32>
    %262 = arith.mulf %261, %161 : vector<1x16xf32>
    %263 = vector.broadcast %28 : f32 to vector<1x16xf32>
    %264 = arith.mulf %263, %162 : vector<1x16xf32>
    %265 = arith.addf %258, %260 : vector<1x16xf32>
    %266 = arith.addf %262, %264 : vector<1x16xf32>
    %267 = arith.addf %265, %266 : vector<1x16xf32>
    %268 = vector.broadcast %29 : f32 to vector<1x16xf32>
    %269 = arith.mulf %268, %167 : vector<1x16xf32>
    %270 = vector.broadcast %30 : f32 to vector<1x16xf32>
    %271 = arith.mulf %270, %168 : vector<1x16xf32>
    %272 = vector.broadcast %31 : f32 to vector<1x16xf32>
    %273 = arith.mulf %272, %169 : vector<1x16xf32>
    %274 = vector.broadcast %32 : f32 to vector<1x16xf32>
    %275 = arith.mulf %274, %170 : vector<1x16xf32>
    %276 = arith.addf %269, %271 : vector<1x16xf32>
    %277 = arith.addf %273, %275 : vector<1x16xf32>
    %278 = arith.addf %276, %277 : vector<1x16xf32>
    %279 = vector.broadcast %33 : f32 to vector<1x16xf32>
    %280 = arith.mulf %279, %175 : vector<1x16xf32>
    %281 = vector.broadcast %34 : f32 to vector<1x16xf32>
    %282 = arith.mulf %281, %176 : vector<1x16xf32>
    %283 = vector.broadcast %35 : f32 to vector<1x16xf32>
    %284 = arith.mulf %283, %177 : vector<1x16xf32>
    %285 = vector.broadcast %36 : f32 to vector<1x16xf32>
    %286 = arith.mulf %285, %178 : vector<1x16xf32>
    %287 = arith.addf %280, %282 : vector<1x16xf32>
    %288 = arith.addf %284, %286 : vector<1x16xf32>
    %289 = arith.addf %287, %288 : vector<1x16xf32>
    %290 = arith.addf %267, %278 : vector<1x16xf32>
    %291 = vector.broadcast %51 : f32 to vector<1x16xf32>
    %292 = arith.addf %289, %291 : vector<1x16xf32>
    %293 = arith.addf %290, %292 : vector<1x16xf32>
    %294 = vector.broadcast %37 : f32 to vector<1x16xf32>
    %295 = arith.mulf %294, %159 : vector<1x16xf32>
    %296 = vector.broadcast %38 : f32 to vector<1x16xf32>
    %297 = arith.mulf %296, %160 : vector<1x16xf32>
    %298 = vector.broadcast %39 : f32 to vector<1x16xf32>
    %299 = arith.mulf %298, %161 : vector<1x16xf32>
    %300 = vector.broadcast %40 : f32 to vector<1x16xf32>
    %301 = arith.mulf %300, %162 : vector<1x16xf32>
    %302 = arith.addf %295, %297 : vector<1x16xf32>
    %303 = arith.addf %299, %301 : vector<1x16xf32>
    %304 = arith.addf %302, %303 : vector<1x16xf32>
    %305 = vector.broadcast %41 : f32 to vector<1x16xf32>
    %306 = arith.mulf %305, %167 : vector<1x16xf32>
    %307 = vector.broadcast %42 : f32 to vector<1x16xf32>
    %308 = arith.mulf %307, %168 : vector<1x16xf32>
    %309 = vector.broadcast %43 : f32 to vector<1x16xf32>
    %310 = arith.mulf %309, %169 : vector<1x16xf32>
    %311 = vector.broadcast %44 : f32 to vector<1x16xf32>
    %312 = arith.mulf %311, %170 : vector<1x16xf32>
    %313 = arith.addf %306, %308 : vector<1x16xf32>
    %314 = arith.addf %310, %312 : vector<1x16xf32>
    %315 = arith.addf %313, %314 : vector<1x16xf32>
    %316 = vector.broadcast %45 : f32 to vector<1x16xf32>
    %317 = arith.mulf %316, %175 : vector<1x16xf32>
    %318 = vector.broadcast %46 : f32 to vector<1x16xf32>
    %319 = arith.mulf %318, %176 : vector<1x16xf32>
    %320 = vector.broadcast %47 : f32 to vector<1x16xf32>
    %321 = arith.mulf %320, %177 : vector<1x16xf32>
    %322 = vector.broadcast %48 : f32 to vector<1x16xf32>
    %323 = arith.mulf %322, %178 : vector<1x16xf32>
    %324 = arith.addf %317, %319 : vector<1x16xf32>
    %325 = arith.addf %321, %323 : vector<1x16xf32>
    %326 = arith.addf %324, %325 : vector<1x16xf32>
    %327 = arith.addf %304, %315 : vector<1x16xf32>
    %328 = vector.broadcast %52 : f32 to vector<1x16xf32>
    %329 = arith.addf %326, %328 : vector<1x16xf32>
    %330 = arith.addf %327, %329 : vector<1x16xf32>
    %331 = vector.broadcast %1 : f32 to vector<1x16xf32>
    %332 = arith.mulf %331, %163 : vector<1x16xf32>
    %333 = vector.broadcast %2 : f32 to vector<1x16xf32>
    %334 = arith.mulf %333, %164 : vector<1x16xf32>
    %335 = vector.broadcast %3 : f32 to vector<1x16xf32>
    %336 = arith.mulf %335, %165 : vector<1x16xf32>
    %337 = vector.broadcast %4 : f32 to vector<1x16xf32>
    %338 = arith.mulf %337, %166 : vector<1x16xf32>
    %339 = arith.addf %332, %334 : vector<1x16xf32>
    %340 = arith.addf %336, %338 : vector<1x16xf32>
    %341 = arith.addf %339, %340 : vector<1x16xf32>
    %342 = vector.broadcast %5 : f32 to vector<1x16xf32>
    %343 = arith.mulf %342, %171 : vector<1x16xf32>
    %344 = vector.broadcast %6 : f32 to vector<1x16xf32>
    %345 = arith.mulf %344, %172 : vector<1x16xf32>
    %346 = vector.broadcast %7 : f32 to vector<1x16xf32>
    %347 = arith.mulf %346, %173 : vector<1x16xf32>
    %348 = vector.broadcast %8 : f32 to vector<1x16xf32>
    %349 = arith.mulf %348, %174 : vector<1x16xf32>
    %350 = arith.addf %343, %345 : vector<1x16xf32>
    %351 = arith.addf %347, %349 : vector<1x16xf32>
    %352 = arith.addf %350, %351 : vector<1x16xf32>
    %353 = vector.broadcast %9 : f32 to vector<1x16xf32>
    %354 = arith.mulf %353, %179 : vector<1x16xf32>
    %355 = vector.broadcast %10 : f32 to vector<1x16xf32>
    %356 = arith.mulf %355, %180 : vector<1x16xf32>
    %357 = vector.broadcast %11 : f32 to vector<1x16xf32>
    %358 = arith.mulf %357, %181 : vector<1x16xf32>
    %359 = vector.broadcast %12 : f32 to vector<1x16xf32>
    %360 = arith.mulf %359, %182 : vector<1x16xf32>
    %361 = arith.addf %354, %356 : vector<1x16xf32>
    %362 = arith.addf %358, %360 : vector<1x16xf32>
    %363 = arith.addf %361, %362 : vector<1x16xf32>
    %364 = arith.addf %341, %352 : vector<1x16xf32>
    %365 = vector.broadcast %49 : f32 to vector<1x16xf32>
    %366 = arith.addf %363, %365 : vector<1x16xf32>
    %367 = arith.addf %364, %366 : vector<1x16xf32>
    %368 = vector.broadcast %13 : f32 to vector<1x16xf32>
    %369 = arith.mulf %368, %163 : vector<1x16xf32>
    %370 = vector.broadcast %14 : f32 to vector<1x16xf32>
    %371 = arith.mulf %370, %164 : vector<1x16xf32>
    %372 = vector.broadcast %15 : f32 to vector<1x16xf32>
    %373 = arith.mulf %372, %165 : vector<1x16xf32>
    %374 = vector.broadcast %16 : f32 to vector<1x16xf32>
    %375 = arith.mulf %374, %166 : vector<1x16xf32>
    %376 = arith.addf %369, %371 : vector<1x16xf32>
    %377 = arith.addf %373, %375 : vector<1x16xf32>
    %378 = arith.addf %376, %377 : vector<1x16xf32>
    %379 = vector.broadcast %17 : f32 to vector<1x16xf32>
    %380 = arith.mulf %379, %171 : vector<1x16xf32>
    %381 = vector.broadcast %18 : f32 to vector<1x16xf32>
    %382 = arith.mulf %381, %172 : vector<1x16xf32>
    %383 = vector.broadcast %19 : f32 to vector<1x16xf32>
    %384 = arith.mulf %383, %173 : vector<1x16xf32>
    %385 = vector.broadcast %20 : f32 to vector<1x16xf32>
    %386 = arith.mulf %385, %174 : vector<1x16xf32>
    %387 = arith.addf %380, %382 : vector<1x16xf32>
    %388 = arith.addf %384, %386 : vector<1x16xf32>
    %389 = arith.addf %387, %388 : vector<1x16xf32>
    %390 = vector.broadcast %21 : f32 to vector<1x16xf32>
    %391 = arith.mulf %390, %179 : vector<1x16xf32>
    %392 = vector.broadcast %22 : f32 to vector<1x16xf32>
    %393 = arith.mulf %392, %180 : vector<1x16xf32>
    %394 = vector.broadcast %23 : f32 to vector<1x16xf32>
    %395 = arith.mulf %394, %181 : vector<1x16xf32>
    %396 = vector.broadcast %24 : f32 to vector<1x16xf32>
    %397 = arith.mulf %396, %182 : vector<1x16xf32>
    %398 = arith.addf %391, %393 : vector<1x16xf32>
    %399 = arith.addf %395, %397 : vector<1x16xf32>
    %400 = arith.addf %398, %399 : vector<1x16xf32>
    %401 = arith.addf %378, %389 : vector<1x16xf32>
    %402 = vector.broadcast %50 : f32 to vector<1x16xf32>
    %403 = arith.addf %400, %402 : vector<1x16xf32>
    %404 = arith.addf %401, %403 : vector<1x16xf32>
    %405 = vector.broadcast %25 : f32 to vector<1x16xf32>
    %406 = arith.mulf %405, %163 : vector<1x16xf32>
    %407 = vector.broadcast %26 : f32 to vector<1x16xf32>
    %408 = arith.mulf %407, %164 : vector<1x16xf32>
    %409 = vector.broadcast %27 : f32 to vector<1x16xf32>
    %410 = arith.mulf %409, %165 : vector<1x16xf32>
    %411 = vector.broadcast %28 : f32 to vector<1x16xf32>
    %412 = arith.mulf %411, %166 : vector<1x16xf32>
    %413 = arith.addf %406, %408 : vector<1x16xf32>
    %414 = arith.addf %410, %412 : vector<1x16xf32>
    %415 = arith.addf %413, %414 : vector<1x16xf32>
    %416 = vector.broadcast %29 : f32 to vector<1x16xf32>
    %417 = arith.mulf %416, %171 : vector<1x16xf32>
    %418 = vector.broadcast %30 : f32 to vector<1x16xf32>
    %419 = arith.mulf %418, %172 : vector<1x16xf32>
    %420 = vector.broadcast %31 : f32 to vector<1x16xf32>
    %421 = arith.mulf %420, %173 : vector<1x16xf32>
    %422 = vector.broadcast %32 : f32 to vector<1x16xf32>
    %423 = arith.mulf %422, %174 : vector<1x16xf32>
    %424 = arith.addf %417, %419 : vector<1x16xf32>
    %425 = arith.addf %421, %423 : vector<1x16xf32>
    %426 = arith.addf %424, %425 : vector<1x16xf32>
    %427 = vector.broadcast %33 : f32 to vector<1x16xf32>
    %428 = arith.mulf %427, %179 : vector<1x16xf32>
    %429 = vector.broadcast %34 : f32 to vector<1x16xf32>
    %430 = arith.mulf %429, %180 : vector<1x16xf32>
    %431 = vector.broadcast %35 : f32 to vector<1x16xf32>
    %432 = arith.mulf %431, %181 : vector<1x16xf32>
    %433 = vector.broadcast %36 : f32 to vector<1x16xf32>
    %434 = arith.mulf %433, %182 : vector<1x16xf32>
    %435 = arith.addf %428, %430 : vector<1x16xf32>
    %436 = arith.addf %432, %434 : vector<1x16xf32>
    %437 = arith.addf %435, %436 : vector<1x16xf32>
    %438 = arith.addf %415, %426 : vector<1x16xf32>
    %439 = vector.broadcast %51 : f32 to vector<1x16xf32>
    %440 = arith.addf %437, %439 : vector<1x16xf32>
    %441 = arith.addf %438, %440 : vector<1x16xf32>
    %442 = vector.broadcast %37 : f32 to vector<1x16xf32>
    %443 = arith.mulf %442, %163 : vector<1x16xf32>
    %444 = vector.broadcast %38 : f32 to vector<1x16xf32>
    %445 = arith.mulf %444, %164 : vector<1x16xf32>
    %446 = vector.broadcast %39 : f32 to vector<1x16xf32>
    %447 = arith.mulf %446, %165 : vector<1x16xf32>
    %448 = vector.broadcast %40 : f32 to vector<1x16xf32>
    %449 = arith.mulf %448, %166 : vector<1x16xf32>
    %450 = arith.addf %443, %445 : vector<1x16xf32>
    %451 = arith.addf %447, %449 : vector<1x16xf32>
    %452 = arith.addf %450, %451 : vector<1x16xf32>
    %453 = vector.broadcast %41 : f32 to vector<1x16xf32>
    %454 = arith.mulf %453, %171 : vector<1x16xf32>
    %455 = vector.broadcast %42 : f32 to vector<1x16xf32>
    %456 = arith.mulf %455, %172 : vector<1x16xf32>
    %457 = vector.broadcast %43 : f32 to vector<1x16xf32>
    %458 = arith.mulf %457, %173 : vector<1x16xf32>
    %459 = vector.broadcast %44 : f32 to vector<1x16xf32>
    %460 = arith.mulf %459, %174 : vector<1x16xf32>
    %461 = arith.addf %454, %456 : vector<1x16xf32>
    %462 = arith.addf %458, %460 : vector<1x16xf32>
    %463 = arith.addf %461, %462 : vector<1x16xf32>
    %464 = vector.broadcast %45 : f32 to vector<1x16xf32>
    %465 = arith.mulf %464, %179 : vector<1x16xf32>
    %466 = vector.broadcast %46 : f32 to vector<1x16xf32>
    %467 = arith.mulf %466, %180 : vector<1x16xf32>
    %468 = vector.broadcast %47 : f32 to vector<1x16xf32>
    %469 = arith.mulf %468, %181 : vector<1x16xf32>
    %470 = vector.broadcast %48 : f32 to vector<1x16xf32>
    %471 = arith.mulf %470, %182 : vector<1x16xf32>
    %472 = arith.addf %465, %467 : vector<1x16xf32>
    %473 = arith.addf %469, %471 : vector<1x16xf32>
    %474 = arith.addf %472, %473 : vector<1x16xf32>
    %475 = arith.addf %452, %463 : vector<1x16xf32>
    %476 = vector.broadcast %52 : f32 to vector<1x16xf32>
    %477 = arith.addf %474, %476 : vector<1x16xf32>
    %478 = arith.addf %475, %477 : vector<1x16xf32>
    %479 = tpu.concatenate %219, %256, %293, %330, %367, %404, %441, %478 in 0 : vector<1x16xf32>, vector<1x16xf32>, vector<1x16xf32>, vector<1x16xf32>, vector<1x16xf32>, vector<1x16xf32>, vector<1x16xf32>, vector<1x16xf32> -> vector<8x16xf32>
    %cst = arith.constant 0.000000e+00 : f32
    %480 = vector.broadcast %cst : f32 to vector<8x16xf32>
    %481 = arith.cmpf ogt, %479, %480 : vector<8x16xf32>
    %cst_2 = arith.constant 0.000000e+00 : f32
    %482 = vector.broadcast %cst_2 : f32 to vector<8x16xf32>
    %483 = arith.minimumf %479, %482 : vector<8x16xf32>
    %484 = math.exp %483 : vector<8x16xf32>
    %cst_3 = arith.constant 1.000000e+00 : f32
    %485 = vector.broadcast %cst_3 : f32 to vector<8x16xf32>
    %486 = arith.subf %484, %485 : vector<8x16xf32>
    %487 = arith.select %481, %479, %486 : vector<8x16xi1>, vector<8x16xf32>
    %488 = vector.extract_strided_slice %487 {offsets = [0, 1], sizes = [8, 1], strides = [1, 1]} : vector<8x16xf32> to vector<8x1xf32>
    %489 = vector.extract_strided_slice %487 {offsets = [0, 0], sizes = [8, 15], strides = [1, 1]} : vector<8x16xf32> to vector<8x15xf32>
    %490 = tpu.concatenate %488, %489 in 1 : vector<8x1xf32>, vector<8x15xf32> -> vector<8x16xf32>
    %491 = vector.extract_strided_slice %487 {offsets = [0, 1], sizes = [8, 15], strides = [1, 1]} : vector<8x16xf32> to vector<8x15xf32>
    %492 = vector.extract_strided_slice %487 {offsets = [0, 14], sizes = [8, 1], strides = [1, 1]} : vector<8x16xf32> to vector<8x1xf32>
    %493 = tpu.concatenate %491, %492 in 1 : vector<8x15xf32>, vector<8x1xf32> -> vector<8x16xf32>
    %494 = vector.extract_strided_slice %490 {offsets = [0, 0], sizes = [1, 16], strides = [1, 1]} : vector<8x16xf32> to vector<1x16xf32>
    %495 = vector.extract_strided_slice %490 {offsets = [1, 0], sizes = [1, 16], strides = [1, 1]} : vector<8x16xf32> to vector<1x16xf32>
    %496 = vector.extract_strided_slice %490 {offsets = [2, 0], sizes = [1, 16], strides = [1, 1]} : vector<8x16xf32> to vector<1x16xf32>
    %497 = vector.extract_strided_slice %490 {offsets = [3, 0], sizes = [1, 16], strides = [1, 1]} : vector<8x16xf32> to vector<1x16xf32>
    %498 = vector.extract_strided_slice %490 {offsets = [4, 0], sizes = [1, 16], strides = [1, 1]} : vector<8x16xf32> to vector<1x16xf32>
    %499 = vector.extract_strided_slice %490 {offsets = [5, 0], sizes = [1, 16], strides = [1, 1]} : vector<8x16xf32> to vector<1x16xf32>
    %500 = vector.extract_strided_slice %490 {offsets = [6, 0], sizes = [1, 16], strides = [1, 1]} : vector<8x16xf32> to vector<1x16xf32>
    %501 = vector.extract_strided_slice %490 {offsets = [7, 0], sizes = [1, 16], strides = [1, 1]} : vector<8x16xf32> to vector<1x16xf32>
    %502 = vector.extract_strided_slice %487 {offsets = [0, 0], sizes = [1, 16], strides = [1, 1]} : vector<8x16xf32> to vector<1x16xf32>
    %503 = vector.extract_strided_slice %487 {offsets = [1, 0], sizes = [1, 16], strides = [1, 1]} : vector<8x16xf32> to vector<1x16xf32>
    %504 = vector.extract_strided_slice %487 {offsets = [2, 0], sizes = [1, 16], strides = [1, 1]} : vector<8x16xf32> to vector<1x16xf32>
    %505 = vector.extract_strided_slice %487 {offsets = [3, 0], sizes = [1, 16], strides = [1, 1]} : vector<8x16xf32> to vector<1x16xf32>
    %506 = vector.extract_strided_slice %487 {offsets = [4, 0], sizes = [1, 16], strides = [1, 1]} : vector<8x16xf32> to vector<1x16xf32>
    %507 = vector.extract_strided_slice %487 {offsets = [5, 0], sizes = [1, 16], strides = [1, 1]} : vector<8x16xf32> to vector<1x16xf32>
    %508 = vector.extract_strided_slice %487 {offsets = [6, 0], sizes = [1, 16], strides = [1, 1]} : vector<8x16xf32> to vector<1x16xf32>
    %509 = vector.extract_strided_slice %487 {offsets = [7, 0], sizes = [1, 16], strides = [1, 1]} : vector<8x16xf32> to vector<1x16xf32>
    %510 = vector.extract_strided_slice %493 {offsets = [0, 0], sizes = [1, 16], strides = [1, 1]} : vector<8x16xf32> to vector<1x16xf32>
    %511 = vector.extract_strided_slice %493 {offsets = [1, 0], sizes = [1, 16], strides = [1, 1]} : vector<8x16xf32> to vector<1x16xf32>
    %512 = vector.extract_strided_slice %493 {offsets = [2, 0], sizes = [1, 16], strides = [1, 1]} : vector<8x16xf32> to vector<1x16xf32>
    %513 = vector.extract_strided_slice %493 {offsets = [3, 0], sizes = [1, 16], strides = [1, 1]} : vector<8x16xf32> to vector<1x16xf32>
    %514 = vector.extract_strided_slice %493 {offsets = [4, 0], sizes = [1, 16], strides = [1, 1]} : vector<8x16xf32> to vector<1x16xf32>
    %515 = vector.extract_strided_slice %493 {offsets = [5, 0], sizes = [1, 16], strides = [1, 1]} : vector<8x16xf32> to vector<1x16xf32>
    %516 = vector.extract_strided_slice %493 {offsets = [6, 0], sizes = [1, 16], strides = [1, 1]} : vector<8x16xf32> to vector<1x16xf32>
    %517 = vector.extract_strided_slice %493 {offsets = [7, 0], sizes = [1, 16], strides = [1, 1]} : vector<8x16xf32> to vector<1x16xf32>
    %518 = vector.broadcast %53 : f32 to vector<1x16xf32>
    %519 = arith.mulf %518, %159 : vector<1x16xf32>
    %520 = vector.broadcast %54 : f32 to vector<1x16xf32>
    %521 = arith.mulf %520, %160 : vector<1x16xf32>
    %522 = vector.broadcast %55 : f32 to vector<1x16xf32>
    %523 = arith.mulf %522, %161 : vector<1x16xf32>
    %524 = vector.broadcast %56 : f32 to vector<1x16xf32>
    %525 = arith.mulf %524, %162 : vector<1x16xf32>
    %526 = vector.broadcast %57 : f32 to vector<1x16xf32>
    %527 = arith.mulf %526, %494 : vector<1x16xf32>
    %528 = vector.broadcast %58 : f32 to vector<1x16xf32>
    %529 = arith.mulf %528, %495 : vector<1x16xf32>
    %530 = vector.broadcast %59 : f32 to vector<1x16xf32>
    %531 = arith.mulf %530, %496 : vector<1x16xf32>
    %532 = vector.broadcast %60 : f32 to vector<1x16xf32>
    %533 = arith.mulf %532, %497 : vector<1x16xf32>
    %534 = arith.addf %519, %521 : vector<1x16xf32>
    %535 = arith.addf %523, %525 : vector<1x16xf32>
    %536 = arith.addf %527, %529 : vector<1x16xf32>
    %537 = arith.addf %531, %533 : vector<1x16xf32>
    %538 = arith.addf %534, %535 : vector<1x16xf32>
    %539 = arith.addf %536, %537 : vector<1x16xf32>
    %540 = arith.addf %538, %539 : vector<1x16xf32>
    %541 = vector.broadcast %61 : f32 to vector<1x16xf32>
    %542 = arith.mulf %541, %167 : vector<1x16xf32>
    %543 = vector.broadcast %62 : f32 to vector<1x16xf32>
    %544 = arith.mulf %543, %168 : vector<1x16xf32>
    %545 = vector.broadcast %63 : f32 to vector<1x16xf32>
    %546 = arith.mulf %545, %169 : vector<1x16xf32>
    %547 = vector.broadcast %64 : f32 to vector<1x16xf32>
    %548 = arith.mulf %547, %170 : vector<1x16xf32>
    %549 = vector.broadcast %65 : f32 to vector<1x16xf32>
    %550 = arith.mulf %549, %502 : vector<1x16xf32>
    %551 = vector.broadcast %66 : f32 to vector<1x16xf32>
    %552 = arith.mulf %551, %503 : vector<1x16xf32>
    %553 = vector.broadcast %67 : f32 to vector<1x16xf32>
    %554 = arith.mulf %553, %504 : vector<1x16xf32>
    %555 = vector.broadcast %68 : f32 to vector<1x16xf32>
    %556 = arith.mulf %555, %505 : vector<1x16xf32>
    %557 = arith.addf %542, %544 : vector<1x16xf32>
    %558 = arith.addf %546, %548 : vector<1x16xf32>
    %559 = arith.addf %550, %552 : vector<1x16xf32>
    %560 = arith.addf %554, %556 : vector<1x16xf32>
    %561 = arith.addf %557, %558 : vector<1x16xf32>
    %562 = arith.addf %559, %560 : vector<1x16xf32>
    %563 = arith.addf %561, %562 : vector<1x16xf32>
    %564 = vector.broadcast %69 : f32 to vector<1x16xf32>
    %565 = arith.mulf %564, %175 : vector<1x16xf32>
    %566 = vector.broadcast %70 : f32 to vector<1x16xf32>
    %567 = arith.mulf %566, %176 : vector<1x16xf32>
    %568 = vector.broadcast %71 : f32 to vector<1x16xf32>
    %569 = arith.mulf %568, %177 : vector<1x16xf32>
    %570 = vector.broadcast %72 : f32 to vector<1x16xf32>
    %571 = arith.mulf %570, %178 : vector<1x16xf32>
    %572 = vector.broadcast %73 : f32 to vector<1x16xf32>
    %573 = arith.mulf %572, %510 : vector<1x16xf32>
    %574 = vector.broadcast %74 : f32 to vector<1x16xf32>
    %575 = arith.mulf %574, %511 : vector<1x16xf32>
    %576 = vector.broadcast %75 : f32 to vector<1x16xf32>
    %577 = arith.mulf %576, %512 : vector<1x16xf32>
    %578 = vector.broadcast %76 : f32 to vector<1x16xf32>
    %579 = arith.mulf %578, %513 : vector<1x16xf32>
    %580 = arith.addf %565, %567 : vector<1x16xf32>
    %581 = arith.addf %569, %571 : vector<1x16xf32>
    %582 = arith.addf %573, %575 : vector<1x16xf32>
    %583 = arith.addf %577, %579 : vector<1x16xf32>
    %584 = arith.addf %580, %581 : vector<1x16xf32>
    %585 = arith.addf %582, %583 : vector<1x16xf32>
    %586 = arith.addf %584, %585 : vector<1x16xf32>
    %587 = arith.addf %540, %563 : vector<1x16xf32>
    %588 = vector.broadcast %149 : f32 to vector<1x16xf32>
    %589 = arith.addf %586, %588 : vector<1x16xf32>
    %590 = arith.addf %587, %589 : vector<1x16xf32>
    %591 = vector.broadcast %77 : f32 to vector<1x16xf32>
    %592 = arith.mulf %591, %159 : vector<1x16xf32>
    %593 = vector.broadcast %78 : f32 to vector<1x16xf32>
    %594 = arith.mulf %593, %160 : vector<1x16xf32>
    %595 = vector.broadcast %79 : f32 to vector<1x16xf32>
    %596 = arith.mulf %595, %161 : vector<1x16xf32>
    %597 = vector.broadcast %80 : f32 to vector<1x16xf32>
    %598 = arith.mulf %597, %162 : vector<1x16xf32>
    %599 = vector.broadcast %81 : f32 to vector<1x16xf32>
    %600 = arith.mulf %599, %494 : vector<1x16xf32>
    %601 = vector.broadcast %82 : f32 to vector<1x16xf32>
    %602 = arith.mulf %601, %495 : vector<1x16xf32>
    %603 = vector.broadcast %83 : f32 to vector<1x16xf32>
    %604 = arith.mulf %603, %496 : vector<1x16xf32>
    %605 = vector.broadcast %84 : f32 to vector<1x16xf32>
    %606 = arith.mulf %605, %497 : vector<1x16xf32>
    %607 = arith.addf %592, %594 : vector<1x16xf32>
    %608 = arith.addf %596, %598 : vector<1x16xf32>
    %609 = arith.addf %600, %602 : vector<1x16xf32>
    %610 = arith.addf %604, %606 : vector<1x16xf32>
    %611 = arith.addf %607, %608 : vector<1x16xf32>
    %612 = arith.addf %609, %610 : vector<1x16xf32>
    %613 = arith.addf %611, %612 : vector<1x16xf32>
    %614 = vector.broadcast %85 : f32 to vector<1x16xf32>
    %615 = arith.mulf %614, %167 : vector<1x16xf32>
    %616 = vector.broadcast %86 : f32 to vector<1x16xf32>
    %617 = arith.mulf %616, %168 : vector<1x16xf32>
    %618 = vector.broadcast %87 : f32 to vector<1x16xf32>
    %619 = arith.mulf %618, %169 : vector<1x16xf32>
    %620 = vector.broadcast %88 : f32 to vector<1x16xf32>
    %621 = arith.mulf %620, %170 : vector<1x16xf32>
    %622 = vector.broadcast %89 : f32 to vector<1x16xf32>
    %623 = arith.mulf %622, %502 : vector<1x16xf32>
    %624 = vector.broadcast %90 : f32 to vector<1x16xf32>
    %625 = arith.mulf %624, %503 : vector<1x16xf32>
    %626 = vector.broadcast %91 : f32 to vector<1x16xf32>
    %627 = arith.mulf %626, %504 : vector<1x16xf32>
    %628 = vector.broadcast %92 : f32 to vector<1x16xf32>
    %629 = arith.mulf %628, %505 : vector<1x16xf32>
    %630 = arith.addf %615, %617 : vector<1x16xf32>
    %631 = arith.addf %619, %621 : vector<1x16xf32>
    %632 = arith.addf %623, %625 : vector<1x16xf32>
    %633 = arith.addf %627, %629 : vector<1x16xf32>
    %634 = arith.addf %630, %631 : vector<1x16xf32>
    %635 = arith.addf %632, %633 : vector<1x16xf32>
    %636 = arith.addf %634, %635 : vector<1x16xf32>
    %637 = vector.broadcast %93 : f32 to vector<1x16xf32>
    %638 = arith.mulf %637, %175 : vector<1x16xf32>
    %639 = vector.broadcast %94 : f32 to vector<1x16xf32>
    %640 = arith.mulf %639, %176 : vector<1x16xf32>
    %641 = vector.broadcast %95 : f32 to vector<1x16xf32>
    %642 = arith.mulf %641, %177 : vector<1x16xf32>
    %643 = vector.broadcast %96 : f32 to vector<1x16xf32>
    %644 = arith.mulf %643, %178 : vector<1x16xf32>
    %645 = vector.broadcast %97 : f32 to vector<1x16xf32>
    %646 = arith.mulf %645, %510 : vector<1x16xf32>
    %647 = vector.broadcast %98 : f32 to vector<1x16xf32>
    %648 = arith.mulf %647, %511 : vector<1x16xf32>
    %649 = vector.broadcast %99 : f32 to vector<1x16xf32>
    %650 = arith.mulf %649, %512 : vector<1x16xf32>
    %651 = vector.broadcast %100 : f32 to vector<1x16xf32>
    %652 = arith.mulf %651, %513 : vector<1x16xf32>
    %653 = arith.addf %638, %640 : vector<1x16xf32>
    %654 = arith.addf %642, %644 : vector<1x16xf32>
    %655 = arith.addf %646, %648 : vector<1x16xf32>
    %656 = arith.addf %650, %652 : vector<1x16xf32>
    %657 = arith.addf %653, %654 : vector<1x16xf32>
    %658 = arith.addf %655, %656 : vector<1x16xf32>
    %659 = arith.addf %657, %658 : vector<1x16xf32>
    %660 = arith.addf %613, %636 : vector<1x16xf32>
    %661 = vector.broadcast %150 : f32 to vector<1x16xf32>
    %662 = arith.addf %659, %661 : vector<1x16xf32>
    %663 = arith.addf %660, %662 : vector<1x16xf32>
    %664 = vector.broadcast %101 : f32 to vector<1x16xf32>
    %665 = arith.mulf %664, %159 : vector<1x16xf32>
    %666 = vector.broadcast %102 : f32 to vector<1x16xf32>
    %667 = arith.mulf %666, %160 : vector<1x16xf32>
    %668 = vector.broadcast %103 : f32 to vector<1x16xf32>
    %669 = arith.mulf %668, %161 : vector<1x16xf32>
    %670 = vector.broadcast %104 : f32 to vector<1x16xf32>
    %671 = arith.mulf %670, %162 : vector<1x16xf32>
    %672 = vector.broadcast %105 : f32 to vector<1x16xf32>
    %673 = arith.mulf %672, %494 : vector<1x16xf32>
    %674 = vector.broadcast %106 : f32 to vector<1x16xf32>
    %675 = arith.mulf %674, %495 : vector<1x16xf32>
    %676 = vector.broadcast %107 : f32 to vector<1x16xf32>
    %677 = arith.mulf %676, %496 : vector<1x16xf32>
    %678 = vector.broadcast %108 : f32 to vector<1x16xf32>
    %679 = arith.mulf %678, %497 : vector<1x16xf32>
    %680 = arith.addf %665, %667 : vector<1x16xf32>
    %681 = arith.addf %669, %671 : vector<1x16xf32>
    %682 = arith.addf %673, %675 : vector<1x16xf32>
    %683 = arith.addf %677, %679 : vector<1x16xf32>
    %684 = arith.addf %680, %681 : vector<1x16xf32>
    %685 = arith.addf %682, %683 : vector<1x16xf32>
    %686 = arith.addf %684, %685 : vector<1x16xf32>
    %687 = vector.broadcast %109 : f32 to vector<1x16xf32>
    %688 = arith.mulf %687, %167 : vector<1x16xf32>
    %689 = vector.broadcast %110 : f32 to vector<1x16xf32>
    %690 = arith.mulf %689, %168 : vector<1x16xf32>
    %691 = vector.broadcast %111 : f32 to vector<1x16xf32>
    %692 = arith.mulf %691, %169 : vector<1x16xf32>
    %693 = vector.broadcast %112 : f32 to vector<1x16xf32>
    %694 = arith.mulf %693, %170 : vector<1x16xf32>
    %695 = vector.broadcast %113 : f32 to vector<1x16xf32>
    %696 = arith.mulf %695, %502 : vector<1x16xf32>
    %697 = vector.broadcast %114 : f32 to vector<1x16xf32>
    %698 = arith.mulf %697, %503 : vector<1x16xf32>
    %699 = vector.broadcast %115 : f32 to vector<1x16xf32>
    %700 = arith.mulf %699, %504 : vector<1x16xf32>
    %701 = vector.broadcast %116 : f32 to vector<1x16xf32>
    %702 = arith.mulf %701, %505 : vector<1x16xf32>
    %703 = arith.addf %688, %690 : vector<1x16xf32>
    %704 = arith.addf %692, %694 : vector<1x16xf32>
    %705 = arith.addf %696, %698 : vector<1x16xf32>
    %706 = arith.addf %700, %702 : vector<1x16xf32>
    %707 = arith.addf %703, %704 : vector<1x16xf32>
    %708 = arith.addf %705, %706 : vector<1x16xf32>
    %709 = arith.addf %707, %708 : vector<1x16xf32>
    %710 = vector.broadcast %117 : f32 to vector<1x16xf32>
    %711 = arith.mulf %710, %175 : vector<1x16xf32>
    %712 = vector.broadcast %118 : f32 to vector<1x16xf32>
    %713 = arith.mulf %712, %176 : vector<1x16xf32>
    %714 = vector.broadcast %119 : f32 to vector<1x16xf32>
    %715 = arith.mulf %714, %177 : vector<1x16xf32>
    %716 = vector.broadcast %120 : f32 to vector<1x16xf32>
    %717 = arith.mulf %716, %178 : vector<1x16xf32>
    %718 = vector.broadcast %121 : f32 to vector<1x16xf32>
    %719 = arith.mulf %718, %510 : vector<1x16xf32>
    %720 = vector.broadcast %122 : f32 to vector<1x16xf32>
    %721 = arith.mulf %720, %511 : vector<1x16xf32>
    %722 = vector.broadcast %123 : f32 to vector<1x16xf32>
    %723 = arith.mulf %722, %512 : vector<1x16xf32>
    %724 = vector.broadcast %124 : f32 to vector<1x16xf32>
    %725 = arith.mulf %724, %513 : vector<1x16xf32>
    %726 = arith.addf %711, %713 : vector<1x16xf32>
    %727 = arith.addf %715, %717 : vector<1x16xf32>
    %728 = arith.addf %719, %721 : vector<1x16xf32>
    %729 = arith.addf %723, %725 : vector<1x16xf32>
    %730 = arith.addf %726, %727 : vector<1x16xf32>
    %731 = arith.addf %728, %729 : vector<1x16xf32>
    %732 = arith.addf %730, %731 : vector<1x16xf32>
    %733 = arith.addf %686, %709 : vector<1x16xf32>
    %734 = vector.broadcast %151 : f32 to vector<1x16xf32>
    %735 = arith.addf %732, %734 : vector<1x16xf32>
    %736 = arith.addf %733, %735 : vector<1x16xf32>
    %737 = vector.broadcast %125 : f32 to vector<1x16xf32>
    %738 = arith.mulf %737, %159 : vector<1x16xf32>
    %739 = vector.broadcast %126 : f32 to vector<1x16xf32>
    %740 = arith.mulf %739, %160 : vector<1x16xf32>
    %741 = vector.broadcast %127 : f32 to vector<1x16xf32>
    %742 = arith.mulf %741, %161 : vector<1x16xf32>
    %743 = vector.broadcast %128 : f32 to vector<1x16xf32>
    %744 = arith.mulf %743, %162 : vector<1x16xf32>
    %745 = vector.broadcast %129 : f32 to vector<1x16xf32>
    %746 = arith.mulf %745, %494 : vector<1x16xf32>
    %747 = vector.broadcast %130 : f32 to vector<1x16xf32>
    %748 = arith.mulf %747, %495 : vector<1x16xf32>
    %749 = vector.broadcast %131 : f32 to vector<1x16xf32>
    %750 = arith.mulf %749, %496 : vector<1x16xf32>
    %751 = vector.broadcast %132 : f32 to vector<1x16xf32>
    %752 = arith.mulf %751, %497 : vector<1x16xf32>
    %753 = arith.addf %738, %740 : vector<1x16xf32>
    %754 = arith.addf %742, %744 : vector<1x16xf32>
    %755 = arith.addf %746, %748 : vector<1x16xf32>
    %756 = arith.addf %750, %752 : vector<1x16xf32>
    %757 = arith.addf %753, %754 : vector<1x16xf32>
    %758 = arith.addf %755, %756 : vector<1x16xf32>
    %759 = arith.addf %757, %758 : vector<1x16xf32>
    %760 = vector.broadcast %133 : f32 to vector<1x16xf32>
    %761 = arith.mulf %760, %167 : vector<1x16xf32>
    %762 = vector.broadcast %134 : f32 to vector<1x16xf32>
    %763 = arith.mulf %762, %168 : vector<1x16xf32>
    %764 = vector.broadcast %135 : f32 to vector<1x16xf32>
    %765 = arith.mulf %764, %169 : vector<1x16xf32>
    %766 = vector.broadcast %136 : f32 to vector<1x16xf32>
    %767 = arith.mulf %766, %170 : vector<1x16xf32>
    %768 = vector.broadcast %137 : f32 to vector<1x16xf32>
    %769 = arith.mulf %768, %502 : vector<1x16xf32>
    %770 = vector.broadcast %138 : f32 to vector<1x16xf32>
    %771 = arith.mulf %770, %503 : vector<1x16xf32>
    %772 = vector.broadcast %139 : f32 to vector<1x16xf32>
    %773 = arith.mulf %772, %504 : vector<1x16xf32>
    %774 = vector.broadcast %140 : f32 to vector<1x16xf32>
    %775 = arith.mulf %774, %505 : vector<1x16xf32>
    %776 = arith.addf %761, %763 : vector<1x16xf32>
    %777 = arith.addf %765, %767 : vector<1x16xf32>
    %778 = arith.addf %769, %771 : vector<1x16xf32>
    %779 = arith.addf %773, %775 : vector<1x16xf32>
    %780 = arith.addf %776, %777 : vector<1x16xf32>
    %781 = arith.addf %778, %779 : vector<1x16xf32>
    %782 = arith.addf %780, %781 : vector<1x16xf32>
    %783 = vector.broadcast %141 : f32 to vector<1x16xf32>
    %784 = arith.mulf %783, %175 : vector<1x16xf32>
    %785 = vector.broadcast %142 : f32 to vector<1x16xf32>
    %786 = arith.mulf %785, %176 : vector<1x16xf32>
    %787 = vector.broadcast %143 : f32 to vector<1x16xf32>
    %788 = arith.mulf %787, %177 : vector<1x16xf32>
    %789 = vector.broadcast %144 : f32 to vector<1x16xf32>
    %790 = arith.mulf %789, %178 : vector<1x16xf32>
    %791 = vector.broadcast %145 : f32 to vector<1x16xf32>
    %792 = arith.mulf %791, %510 : vector<1x16xf32>
    %793 = vector.broadcast %146 : f32 to vector<1x16xf32>
    %794 = arith.mulf %793, %511 : vector<1x16xf32>
    %795 = vector.broadcast %147 : f32 to vector<1x16xf32>
    %796 = arith.mulf %795, %512 : vector<1x16xf32>
    %797 = vector.broadcast %148 : f32 to vector<1x16xf32>
    %798 = arith.mulf %797, %513 : vector<1x16xf32>
    %799 = arith.addf %784, %786 : vector<1x16xf32>
    %800 = arith.addf %788, %790 : vector<1x16xf32>
    %801 = arith.addf %792, %794 : vector<1x16xf32>
    %802 = arith.addf %796, %798 : vector<1x16xf32>
    %803 = arith.addf %799, %800 : vector<1x16xf32>
    %804 = arith.addf %801, %802 : vector<1x16xf32>
    %805 = arith.addf %803, %804 : vector<1x16xf32>
    %806 = arith.addf %759, %782 : vector<1x16xf32>
    %807 = vector.broadcast %152 : f32 to vector<1x16xf32>
    %808 = arith.addf %805, %807 : vector<1x16xf32>
    %809 = arith.addf %806, %808 : vector<1x16xf32>
    %810 = vector.broadcast %53 : f32 to vector<1x16xf32>
    %811 = arith.mulf %810, %163 : vector<1x16xf32>
    %812 = vector.broadcast %54 : f32 to vector<1x16xf32>
    %813 = arith.mulf %812, %164 : vector<1x16xf32>
    %814 = vector.broadcast %55 : f32 to vector<1x16xf32>
    %815 = arith.mulf %814, %165 : vector<1x16xf32>
    %816 = vector.broadcast %56 : f32 to vector<1x16xf32>
    %817 = arith.mulf %816, %166 : vector<1x16xf32>
    %818 = vector.broadcast %57 : f32 to vector<1x16xf32>
    %819 = arith.mulf %818, %498 : vector<1x16xf32>
    %820 = vector.broadcast %58 : f32 to vector<1x16xf32>
    %821 = arith.mulf %820, %499 : vector<1x16xf32>
    %822 = vector.broadcast %59 : f32 to vector<1x16xf32>
    %823 = arith.mulf %822, %500 : vector<1x16xf32>
    %824 = vector.broadcast %60 : f32 to vector<1x16xf32>
    %825 = arith.mulf %824, %501 : vector<1x16xf32>
    %826 = arith.addf %811, %813 : vector<1x16xf32>
    %827 = arith.addf %815, %817 : vector<1x16xf32>
    %828 = arith.addf %819, %821 : vector<1x16xf32>
    %829 = arith.addf %823, %825 : vector<1x16xf32>
    %830 = arith.addf %826, %827 : vector<1x16xf32>
    %831 = arith.addf %828, %829 : vector<1x16xf32>
    %832 = arith.addf %830, %831 : vector<1x16xf32>
    %833 = vector.broadcast %61 : f32 to vector<1x16xf32>
    %834 = arith.mulf %833, %171 : vector<1x16xf32>
    %835 = vector.broadcast %62 : f32 to vector<1x16xf32>
    %836 = arith.mulf %835, %172 : vector<1x16xf32>
    %837 = vector.broadcast %63 : f32 to vector<1x16xf32>
    %838 = arith.mulf %837, %173 : vector<1x16xf32>
    %839 = vector.broadcast %64 : f32 to vector<1x16xf32>
    %840 = arith.mulf %839, %174 : vector<1x16xf32>
    %841 = vector.broadcast %65 : f32 to vector<1x16xf32>
    %842 = arith.mulf %841, %506 : vector<1x16xf32>
    %843 = vector.broadcast %66 : f32 to vector<1x16xf32>
    %844 = arith.mulf %843, %507 : vector<1x16xf32>
    %845 = vector.broadcast %67 : f32 to vector<1x16xf32>
    %846 = arith.mulf %845, %508 : vector<1x16xf32>
    %847 = vector.broadcast %68 : f32 to vector<1x16xf32>
    %848 = arith.mulf %847, %509 : vector<1x16xf32>
    %849 = arith.addf %834, %836 : vector<1x16xf32>
    %850 = arith.addf %838, %840 : vector<1x16xf32>
    %851 = arith.addf %842, %844 : vector<1x16xf32>
    %852 = arith.addf %846, %848 : vector<1x16xf32>
    %853 = arith.addf %849, %850 : vector<1x16xf32>
    %854 = arith.addf %851, %852 : vector<1x16xf32>
    %855 = arith.addf %853, %854 : vector<1x16xf32>
    %856 = vector.broadcast %69 : f32 to vector<1x16xf32>
    %857 = arith.mulf %856, %179 : vector<1x16xf32>
    %858 = vector.broadcast %70 : f32 to vector<1x16xf32>
    %859 = arith.mulf %858, %180 : vector<1x16xf32>
    %860 = vector.broadcast %71 : f32 to vector<1x16xf32>
    %861 = arith.mulf %860, %181 : vector<1x16xf32>
    %862 = vector.broadcast %72 : f32 to vector<1x16xf32>
    %863 = arith.mulf %862, %182 : vector<1x16xf32>
    %864 = vector.broadcast %73 : f32 to vector<1x16xf32>
    %865 = arith.mulf %864, %514 : vector<1x16xf32>
    %866 = vector.broadcast %74 : f32 to vector<1x16xf32>
    %867 = arith.mulf %866, %515 : vector<1x16xf32>
    %868 = vector.broadcast %75 : f32 to vector<1x16xf32>
    %869 = arith.mulf %868, %516 : vector<1x16xf32>
    %870 = vector.broadcast %76 : f32 to vector<1x16xf32>
    %871 = arith.mulf %870, %517 : vector<1x16xf32>
    %872 = arith.addf %857, %859 : vector<1x16xf32>
    %873 = arith.addf %861, %863 : vector<1x16xf32>
    %874 = arith.addf %865, %867 : vector<1x16xf32>
    %875 = arith.addf %869, %871 : vector<1x16xf32>
    %876 = arith.addf %872, %873 : vector<1x16xf32>
    %877 = arith.addf %874, %875 : vector<1x16xf32>
    %878 = arith.addf %876, %877 : vector<1x16xf32>
    %879 = arith.addf %832, %855 : vector<1x16xf32>
    %880 = vector.broadcast %149 : f32 to vector<1x16xf32>
    %881 = arith.addf %878, %880 : vector<1x16xf32>
    %882 = arith.addf %879, %881 : vector<1x16xf32>
    %883 = vector.broadcast %77 : f32 to vector<1x16xf32>
    %884 = arith.mulf %883, %163 : vector<1x16xf32>
    %885 = vector.broadcast %78 : f32 to vector<1x16xf32>
    %886 = arith.mulf %885, %164 : vector<1x16xf32>
    %887 = vector.broadcast %79 : f32 to vector<1x16xf32>
    %888 = arith.mulf %887, %165 : vector<1x16xf32>
    %889 = vector.broadcast %80 : f32 to vector<1x16xf32>
    %890 = arith.mulf %889, %166 : vector<1x16xf32>
    %891 = vector.broadcast %81 : f32 to vector<1x16xf32>
    %892 = arith.mulf %891, %498 : vector<1x16xf32>
    %893 = vector.broadcast %82 : f32 to vector<1x16xf32>
    %894 = arith.mulf %893, %499 : vector<1x16xf32>
    %895 = vector.broadcast %83 : f32 to vector<1x16xf32>
    %896 = arith.mulf %895, %500 : vector<1x16xf32>
    %897 = vector.broadcast %84 : f32 to vector<1x16xf32>
    %898 = arith.mulf %897, %501 : vector<1x16xf32>
    %899 = arith.addf %884, %886 : vector<1x16xf32>
    %900 = arith.addf %888, %890 : vector<1x16xf32>
    %901 = arith.addf %892, %894 : vector<1x16xf32>
    %902 = arith.addf %896, %898 : vector<1x16xf32>
    %903 = arith.addf %899, %900 : vector<1x16xf32>
    %904 = arith.addf %901, %902 : vector<1x16xf32>
    %905 = arith.addf %903, %904 : vector<1x16xf32>
    %906 = vector.broadcast %85 : f32 to vector<1x16xf32>
    %907 = arith.mulf %906, %171 : vector<1x16xf32>
    %908 = vector.broadcast %86 : f32 to vector<1x16xf32>
    %909 = arith.mulf %908, %172 : vector<1x16xf32>
    %910 = vector.broadcast %87 : f32 to vector<1x16xf32>
    %911 = arith.mulf %910, %173 : vector<1x16xf32>
    %912 = vector.broadcast %88 : f32 to vector<1x16xf32>
    %913 = arith.mulf %912, %174 : vector<1x16xf32>
    %914 = vector.broadcast %89 : f32 to vector<1x16xf32>
    %915 = arith.mulf %914, %506 : vector<1x16xf32>
    %916 = vector.broadcast %90 : f32 to vector<1x16xf32>
    %917 = arith.mulf %916, %507 : vector<1x16xf32>
    %918 = vector.broadcast %91 : f32 to vector<1x16xf32>
    %919 = arith.mulf %918, %508 : vector<1x16xf32>
    %920 = vector.broadcast %92 : f32 to vector<1x16xf32>
    %921 = arith.mulf %920, %509 : vector<1x16xf32>
    %922 = arith.addf %907, %909 : vector<1x16xf32>
    %923 = arith.addf %911, %913 : vector<1x16xf32>
    %924 = arith.addf %915, %917 : vector<1x16xf32>
    %925 = arith.addf %919, %921 : vector<1x16xf32>
    %926 = arith.addf %922, %923 : vector<1x16xf32>
    %927 = arith.addf %924, %925 : vector<1x16xf32>
    %928 = arith.addf %926, %927 : vector<1x16xf32>
    %929 = vector.broadcast %93 : f32 to vector<1x16xf32>
    %930 = arith.mulf %929, %179 : vector<1x16xf32>
    %931 = vector.broadcast %94 : f32 to vector<1x16xf32>
    %932 = arith.mulf %931, %180 : vector<1x16xf32>
    %933 = vector.broadcast %95 : f32 to vector<1x16xf32>
    %934 = arith.mulf %933, %181 : vector<1x16xf32>
    %935 = vector.broadcast %96 : f32 to vector<1x16xf32>
    %936 = arith.mulf %935, %182 : vector<1x16xf32>
    %937 = vector.broadcast %97 : f32 to vector<1x16xf32>
    %938 = arith.mulf %937, %514 : vector<1x16xf32>
    %939 = vector.broadcast %98 : f32 to vector<1x16xf32>
    %940 = arith.mulf %939, %515 : vector<1x16xf32>
    %941 = vector.broadcast %99 : f32 to vector<1x16xf32>
    %942 = arith.mulf %941, %516 : vector<1x16xf32>
    %943 = vector.broadcast %100 : f32 to vector<1x16xf32>
    %944 = arith.mulf %943, %517 : vector<1x16xf32>
    %945 = arith.addf %930, %932 : vector<1x16xf32>
    %946 = arith.addf %934, %936 : vector<1x16xf32>
    %947 = arith.addf %938, %940 : vector<1x16xf32>
    %948 = arith.addf %942, %944 : vector<1x16xf32>
    %949 = arith.addf %945, %946 : vector<1x16xf32>
    %950 = arith.addf %947, %948 : vector<1x16xf32>
    %951 = arith.addf %949, %950 : vector<1x16xf32>
    %952 = arith.addf %905, %928 : vector<1x16xf32>
    %953 = vector.broadcast %150 : f32 to vector<1x16xf32>
    %954 = arith.addf %951, %953 : vector<1x16xf32>
    %955 = arith.addf %952, %954 : vector<1x16xf32>
    %956 = vector.broadcast %101 : f32 to vector<1x16xf32>
    %957 = arith.mulf %956, %163 : vector<1x16xf32>
    %958 = vector.broadcast %102 : f32 to vector<1x16xf32>
    %959 = arith.mulf %958, %164 : vector<1x16xf32>
    %960 = vector.broadcast %103 : f32 to vector<1x16xf32>
    %961 = arith.mulf %960, %165 : vector<1x16xf32>
    %962 = vector.broadcast %104 : f32 to vector<1x16xf32>
    %963 = arith.mulf %962, %166 : vector<1x16xf32>
    %964 = vector.broadcast %105 : f32 to vector<1x16xf32>
    %965 = arith.mulf %964, %498 : vector<1x16xf32>
    %966 = vector.broadcast %106 : f32 to vector<1x16xf32>
    %967 = arith.mulf %966, %499 : vector<1x16xf32>
    %968 = vector.broadcast %107 : f32 to vector<1x16xf32>
    %969 = arith.mulf %968, %500 : vector<1x16xf32>
    %970 = vector.broadcast %108 : f32 to vector<1x16xf32>
    %971 = arith.mulf %970, %501 : vector<1x16xf32>
    %972 = arith.addf %957, %959 : vector<1x16xf32>
    %973 = arith.addf %961, %963 : vector<1x16xf32>
    %974 = arith.addf %965, %967 : vector<1x16xf32>
    %975 = arith.addf %969, %971 : vector<1x16xf32>
    %976 = arith.addf %972, %973 : vector<1x16xf32>
    %977 = arith.addf %974, %975 : vector<1x16xf32>
    %978 = arith.addf %976, %977 : vector<1x16xf32>
    %979 = vector.broadcast %109 : f32 to vector<1x16xf32>
    %980 = arith.mulf %979, %171 : vector<1x16xf32>
    %981 = vector.broadcast %110 : f32 to vector<1x16xf32>
    %982 = arith.mulf %981, %172 : vector<1x16xf32>
    %983 = vector.broadcast %111 : f32 to vector<1x16xf32>
    %984 = arith.mulf %983, %173 : vector<1x16xf32>
    %985 = vector.broadcast %112 : f32 to vector<1x16xf32>
    %986 = arith.mulf %985, %174 : vector<1x16xf32>
    %987 = vector.broadcast %113 : f32 to vector<1x16xf32>
    %988 = arith.mulf %987, %506 : vector<1x16xf32>
    %989 = vector.broadcast %114 : f32 to vector<1x16xf32>
    %990 = arith.mulf %989, %507 : vector<1x16xf32>
    %991 = vector.broadcast %115 : f32 to vector<1x16xf32>
    %992 = arith.mulf %991, %508 : vector<1x16xf32>
    %993 = vector.broadcast %116 : f32 to vector<1x16xf32>
    %994 = arith.mulf %993, %509 : vector<1x16xf32>
    %995 = arith.addf %980, %982 : vector<1x16xf32>
    %996 = arith.addf %984, %986 : vector<1x16xf32>
    %997 = arith.addf %988, %990 : vector<1x16xf32>
    %998 = arith.addf %992, %994 : vector<1x16xf32>
    %999 = arith.addf %995, %996 : vector<1x16xf32>
    %1000 = arith.addf %997, %998 : vector<1x16xf32>
    %1001 = arith.addf %999, %1000 : vector<1x16xf32>
    %1002 = vector.broadcast %117 : f32 to vector<1x16xf32>
    %1003 = arith.mulf %1002, %179 : vector<1x16xf32>
    %1004 = vector.broadcast %118 : f32 to vector<1x16xf32>
    %1005 = arith.mulf %1004, %180 : vector<1x16xf32>
    %1006 = vector.broadcast %119 : f32 to vector<1x16xf32>
    %1007 = arith.mulf %1006, %181 : vector<1x16xf32>
    %1008 = vector.broadcast %120 : f32 to vector<1x16xf32>
    %1009 = arith.mulf %1008, %182 : vector<1x16xf32>
    %1010 = vector.broadcast %121 : f32 to vector<1x16xf32>
    %1011 = arith.mulf %1010, %514 : vector<1x16xf32>
    %1012 = vector.broadcast %122 : f32 to vector<1x16xf32>
    %1013 = arith.mulf %1012, %515 : vector<1x16xf32>
    %1014 = vector.broadcast %123 : f32 to vector<1x16xf32>
    %1015 = arith.mulf %1014, %516 : vector<1x16xf32>
    %1016 = vector.broadcast %124 : f32 to vector<1x16xf32>
    %1017 = arith.mulf %1016, %517 : vector<1x16xf32>
    %1018 = arith.addf %1003, %1005 : vector<1x16xf32>
    %1019 = arith.addf %1007, %1009 : vector<1x16xf32>
    %1020 = arith.addf %1011, %1013 : vector<1x16xf32>
    %1021 = arith.addf %1015, %1017 : vector<1x16xf32>
    %1022 = arith.addf %1018, %1019 : vector<1x16xf32>
    %1023 = arith.addf %1020, %1021 : vector<1x16xf32>
    %1024 = arith.addf %1022, %1023 : vector<1x16xf32>
    %1025 = arith.addf %978, %1001 : vector<1x16xf32>
    %1026 = vector.broadcast %151 : f32 to vector<1x16xf32>
    %1027 = arith.addf %1024, %1026 : vector<1x16xf32>
    %1028 = arith.addf %1025, %1027 : vector<1x16xf32>
    %1029 = vector.broadcast %125 : f32 to vector<1x16xf32>
    %1030 = arith.mulf %1029, %163 : vector<1x16xf32>
    %1031 = vector.broadcast %126 : f32 to vector<1x16xf32>
    %1032 = arith.mulf %1031, %164 : vector<1x16xf32>
    %1033 = vector.broadcast %127 : f32 to vector<1x16xf32>
    %1034 = arith.mulf %1033, %165 : vector<1x16xf32>
    %1035 = vector.broadcast %128 : f32 to vector<1x16xf32>
    %1036 = arith.mulf %1035, %166 : vector<1x16xf32>
    %1037 = vector.broadcast %129 : f32 to vector<1x16xf32>
    %1038 = arith.mulf %1037, %498 : vector<1x16xf32>
    %1039 = vector.broadcast %130 : f32 to vector<1x16xf32>
    %1040 = arith.mulf %1039, %499 : vector<1x16xf32>
    %1041 = vector.broadcast %131 : f32 to vector<1x16xf32>
    %1042 = arith.mulf %1041, %500 : vector<1x16xf32>
    %1043 = vector.broadcast %132 : f32 to vector<1x16xf32>
    %1044 = arith.mulf %1043, %501 : vector<1x16xf32>
    %1045 = arith.addf %1030, %1032 : vector<1x16xf32>
    %1046 = arith.addf %1034, %1036 : vector<1x16xf32>
    %1047 = arith.addf %1038, %1040 : vector<1x16xf32>
    %1048 = arith.addf %1042, %1044 : vector<1x16xf32>
    %1049 = arith.addf %1045, %1046 : vector<1x16xf32>
    %1050 = arith.addf %1047, %1048 : vector<1x16xf32>
    %1051 = arith.addf %1049, %1050 : vector<1x16xf32>
    %1052 = vector.broadcast %133 : f32 to vector<1x16xf32>
    %1053 = arith.mulf %1052, %171 : vector<1x16xf32>
    %1054 = vector.broadcast %134 : f32 to vector<1x16xf32>
    %1055 = arith.mulf %1054, %172 : vector<1x16xf32>
    %1056 = vector.broadcast %135 : f32 to vector<1x16xf32>
    %1057 = arith.mulf %1056, %173 : vector<1x16xf32>
    %1058 = vector.broadcast %136 : f32 to vector<1x16xf32>
    %1059 = arith.mulf %1058, %174 : vector<1x16xf32>
    %1060 = vector.broadcast %137 : f32 to vector<1x16xf32>
    %1061 = arith.mulf %1060, %506 : vector<1x16xf32>
    %1062 = vector.broadcast %138 : f32 to vector<1x16xf32>
    %1063 = arith.mulf %1062, %507 : vector<1x16xf32>
    %1064 = vector.broadcast %139 : f32 to vector<1x16xf32>
    %1065 = arith.mulf %1064, %508 : vector<1x16xf32>
    %1066 = vector.broadcast %140 : f32 to vector<1x16xf32>
    %1067 = arith.mulf %1066, %509 : vector<1x16xf32>
    %1068 = arith.addf %1053, %1055 : vector<1x16xf32>
    %1069 = arith.addf %1057, %1059 : vector<1x16xf32>
    %1070 = arith.addf %1061, %1063 : vector<1x16xf32>
    %1071 = arith.addf %1065, %1067 : vector<1x16xf32>
    %1072 = arith.addf %1068, %1069 : vector<1x16xf32>
    %1073 = arith.addf %1070, %1071 : vector<1x16xf32>
    %1074 = arith.addf %1072, %1073 : vector<1x16xf32>
    %1075 = vector.broadcast %141 : f32 to vector<1x16xf32>
    %1076 = arith.mulf %1075, %179 : vector<1x16xf32>
    %1077 = vector.broadcast %142 : f32 to vector<1x16xf32>
    %1078 = arith.mulf %1077, %180 : vector<1x16xf32>
    %1079 = vector.broadcast %143 : f32 to vector<1x16xf32>
    %1080 = arith.mulf %1079, %181 : vector<1x16xf32>
    %1081 = vector.broadcast %144 : f32 to vector<1x16xf32>
    %1082 = arith.mulf %1081, %182 : vector<1x16xf32>
    %1083 = vector.broadcast %145 : f32 to vector<1x16xf32>
    %1084 = arith.mulf %1083, %514 : vector<1x16xf32>
    %1085 = vector.broadcast %146 : f32 to vector<1x16xf32>
    %1086 = arith.mulf %1085, %515 : vector<1x16xf32>
    %1087 = vector.broadcast %147 : f32 to vector<1x16xf32>
    %1088 = arith.mulf %1087, %516 : vector<1x16xf32>
    %1089 = vector.broadcast %148 : f32 to vector<1x16xf32>
    %1090 = arith.mulf %1089, %517 : vector<1x16xf32>
    %1091 = arith.addf %1076, %1078 : vector<1x16xf32>
    %1092 = arith.addf %1080, %1082 : vector<1x16xf32>
    %1093 = arith.addf %1084, %1086 : vector<1x16xf32>
    %1094 = arith.addf %1088, %1090 : vector<1x16xf32>
    %1095 = arith.addf %1091, %1092 : vector<1x16xf32>
    %1096 = arith.addf %1093, %1094 : vector<1x16xf32>
    %1097 = arith.addf %1095, %1096 : vector<1x16xf32>
    %1098 = arith.addf %1051, %1074 : vector<1x16xf32>
    %1099 = vector.broadcast %152 : f32 to vector<1x16xf32>
    %1100 = arith.addf %1097, %1099 : vector<1x16xf32>
    %1101 = arith.addf %1098, %1100 : vector<1x16xf32>
    %1102 = tpu.concatenate %590, %663, %736, %809, %882, %955, %1028, %1101 in 0 : vector<1x16xf32>, vector<1x16xf32>, vector<1x16xf32>, vector<1x16xf32>, vector<1x16xf32>, vector<1x16xf32>, vector<1x16xf32>, vector<1x16xf32> -> vector<8x16xf32>
    %cst_4 = arith.constant 0.000000e+00 : f32
    %1103 = vector.broadcast %cst_4 : f32 to vector<8x16xf32>
    %1104 = arith.cmpf ogt, %1102, %1103 : vector<8x16xf32>
    %cst_5 = arith.constant 0.000000e+00 : f32
    %1105 = vector.broadcast %cst_5 : f32 to vector<8x16xf32>
    %1106 = arith.minimumf %1102, %1105 : vector<8x16xf32>
    %1107 = math.exp %1106 : vector<8x16xf32>
    %cst_6 = arith.constant 1.000000e+00 : f32
    %1108 = vector.broadcast %cst_6 : f32 to vector<8x16xf32>
    %1109 = arith.subf %1107, %1108 : vector<8x16xf32>
    %1110 = arith.select %1104, %1102, %1109 : vector<8x16xi1>, vector<8x16xf32>
    %cst_7 = arith.constant 2.000000e-01 : f32
    %1111 = vector.broadcast %cst_7 : f32 to vector<8x16xf32>
    %1112 = arith.mulf %1111, %1110 : vector<8x16xf32>
    %1113 = arith.addf %1112, %0 : vector<8x16xf32>
    %c0_8 = arith.constant 0 : index
    %c0_9 = arith.constant 0 : index
    %1114 = vector.load %arg2[%c0_8, %c0_9] : memref<8x16xf32, #tpu.memory_space<vmem>>, vector<8x16xf32>
    tpu.vector_store %arg2[%c0_8, %c0_9], %1113 {strides = array<i32>} : memref<8x16xf32, #tpu.memory_space<vmem>>, vector<8x16xf32>,
    return
  }
}

</mosaic_0001>

<bundles_post_ra>
// kernel: dense_block.1
= control target key start
LH: loop header
LB: loop body
LE: loop exit
PB: predicated region body
PF: predicated region fallthrough
CT: control target
= control target key end

     0   :  { %s2052_s0 = inlined_call_operand.vmem [shape: f32[8,16], index: 0, kind: input, shape index: {}, may-alias: {0,2}]   ;;  %s2053_s1 = inlined_call_operand.vmem [shape: f32[152], index: 1, kind: input, shape index: {}]   ;;  %s2054_s2 = inlined_call_operand.vmem [shape: f32[8,16], index: 2, kind: output, shape index: {}, may-alias: {0,2}]  }
   0x1   :  { %2072 = sst [smem:[#allocation18_spill]] %s2052_s0 }
   0x2   :  { %2073 = sst [smem:[#allocation19_spill]] %s2054_s2 }
   0x3   :  { %7 = vsyncpa [#allocation3], 0  ;;  %s15_s11 = sshll.u32 %s2053_s1, 4  ;;  %s1196_s12 = smov [#allocation2]   ;;  %s16_s11 = int_to_ptr.vmem [resolvable:$true] %s15_s11 }
   0x4   :  { %18 = dma.vmem_to_smem %s16_s11, 32, %s1196_s12, [#allocation3]  }
   0x5   :  { %1194 = dma.done.wait [#allocation3], 32  }
   0x6   :  { %1195 = vsyncadd [#allocation3], 4294967264 }
   0x7   :  { %23 = sfence }
   0x8   :  { %v1220_v0 = vld [vmem:[%s2052_s0] sm:$0xff]  ;;  %s2056_s15 = smov 127   ;;  %s2055_s16 = smov 1   ;;  %vm184_vm0 = vcmask 7168   ;;  %vm186_vm1 = vcmask 121856   ;;  %vm453_vm2 = vcmask 1040384  }
   0x9   :  { %178 = vrot.lane.b32.xlu0 %v1220_v0, %s2056_s15  ;;  %s1226_s1 = sld [smem:[#allocation2]]  ;;  %vm455_vm3 = vcmask 1041408   ;;  %vm457_vm4 = vcmask 1042432   ;;  %vm459_vm5 = vcmask 1043456   ;;  %vm461_vm6 = vcmask 1044480  }
   0xa   :  { %s1228_s17 = sld [smem:[#allocation2 + $0x1]]  ;;  %vm463_vm7 = vcmask 1045504   ;;  %vm465_vm8 = vcmask 1046528   ;;  %vm1014_vm11 = vcmask 130048  }
   0xb   :  { %s1230_s18 = sld [smem:[#allocation2 + $0x2]] }
   0xc   :  { %s1232_s19 = sld [smem:[#allocation2 + $0x3]] }
   0xd   :  { %s1234_s20 = sld [smem:[#allocation2 + $0x4]] }
   0xe   :  { %s1236_s21 = sld [smem:[#allocation2 + $0x5]] }
   0xf   :  { %2074 = sst [smem:[#allocation5_spill]] %s1226_s1  ;;  %v188_v13 = vstv %s1226_s1 }
  0x10   :  { %s1238_s22 = sld [smem:[#allocation2 + $0x6]]  ;;  %v190_v14 = vstv %s1228_s17 }
  0x11   :  { %181 = vrot.lane.b32.xlu0 %v1220_v0, %s2055_s16  ;;  %2075 = sst [smem:[#allocation6_spill]] %s1230_s18  ;;  %v192_v15 = vstv %s1230_s18 }
  0x12   :  { %s1027_s23 = sld [smem:[#allocation2 + $0x7]]  ;;  %v194_v17 = vstv %s1232_s19 }
  0x13   :  { %s1240_s24 = sld [smem:[#allocation2 + $0x8]]  ;;  %v208_v12 = vstv %s1234_s20 }
  0x14   :  { %s1242_s25 = sld [smem:[#allocation2 + $0x9]]  ;;  %v210_v2 = vstv %s1236_s21  ;;  %v209_v21 = vmul.f32 %v208_v12, %v1220_v0 }
  0x15   :  { %s1244_s26 = sld [smem:[#allocation2 + $0xa]]  ;;  %v211_v6 = vmul.f32 %v210_v2, %v1220_v0 }
  0x16   :  { %s1246_s27 = sld [smem:[#allocation2 + $0xb]]  ;;  %v212_v5 = vstv %s1238_s22 }
  0x17   :  { %s1248_s28 = sld [smem:[#allocation2 + $0xc]]  ;;  %v213_v8 = vmul.f32 %v212_v5, %v1220_v0  ;;  %v217_v22 = vrot.slane %v211_v6, 1 }
  0x18   :  { %s1250_s29 = sld [smem:[#allocation2 + $0xd]]  ;;  %v214_v1 = vstv %s1027_s23 }
  0x19   :  { %2076 = sst [smem:[#allocation7_spill]] %s1240_s24  ;;  %v215_v3 = vmul.f32 %v214_v1, %v1220_v0  ;;  %v228_v25 = vstv %s1240_s24  ;;  %v219_v37 = vadd.f32 %v217_v22, %v209_v21 }
  0x1a   :  { %s1252_s30 = sld [smem:[#allocation2 + $0xe]]  ;;  %v230_v26 = vstv %s1242_s25 }
  0x1b   :  { %2077 = sst [smem:[#allocation8_spill]] %s1244_s26  ;;  %v221_v9 = vrot.slane %v215_v3, 1  ;;  %v232_v29 = vstv %s1244_s26 }
  0x1c   :  { %s1254_s3 = sld [smem:[#allocation2 + $0xf]]  ;;  %v234_v30 = vstv %s1246_s27 }
  0x1d   :  { %2078 = sst [smem:[#allocation9_spill]] %s1248_s28  ;;  %v223_v23 = vadd.f32 %v221_v9, %v213_v8  ;;  %v252_v31 = vstv %s1248_s28 }
  0x1e   :  { %s1256_s4 = sld [smem:[#allocation2 + $0x10]]  ;;  %v254_v33 = vstv %s1250_s29 }
  0x1f   :  { %s1258_s5 = sld [smem:[#allocation2 + $0x11]]  ;;  %v225_v38 = vrot.slane %v223_v23, 2 }
  0x20   :  { %2079 = sst [smem:[#allocation10_spill]] %s1252_s30  ;;  %v256_v39 = vstv %s1252_s30 }
  0x21   :  { %s1260_s6 = sld [smem:[#allocation2 + $0x12]]  ;;  %v1361_v54 = vadd.f32 %v225_v38, %v219_v37 }
  0x22   :  { %s1039_s7 = sld [smem:[#allocation2 + $0x13]]  ;;  %v258_v41 = vstv %s1254_s3 }
  0x23   :  { %s1262_s8 = sld [smem:[#allocation2 + $0x14]] }
  0x24   :  { %s1264_s9 = sld [smem:[#allocation2 + $0x15]]  ;;  %v272_v24 = vstv %s1256_s4 }
  0x25   :  { %s1266_s10 = sld [smem:[#allocation2 + $0x16]]  ;;  %v274_v10 = vstv %s1258_s5  ;;  %v273_v34 = vmul.f32 %v272_v24, %v1220_v0 }
  0x26   :  { %s1268_s11 = sld [smem:[#allocation2 + $0x17]]  ;;  %v275_v18 = vmul.f32 %v274_v10, %v1220_v0 }
  0x27   :  { %s1270_s12 = sld [smem:[#allocation2 + $0x18]]  ;;  %v276_v11 = vstv %s1260_s6 }
  0x28   :  { %s1272_s13 = sld [smem:[#allocation2 + $0x19]]  ;;  %v278_v4 = vstv %s1039_s7  ;;  %v277_v19 = vmul.f32 %v276_v11, %v1220_v0  ;;  %v281_v35 = vrot.slane %v275_v18, 1 }
  0x29   :  { %2080 = sst [smem:[#allocation11_spill]] %s1262_s8  ;;  %v279_v7 = vmul.f32 %v278_v4, %v1220_v0  ;;  %v292_v46 = vstv %s1262_s8 }
  0x2a   :  { %s1274_s14 = sld [smem:[#allocation2 + $0x1a]]  ;;  %v294_v47 = vstv %s1264_s9  ;;  %v283_v50 = vadd.f32 %v281_v35, %v273_v34 }
  0x2b   :  { %2081 = sst [smem:[#allocation12_spill]] %s1266_s10  ;;  %v285_v20 = vrot.slane %v279_v7, 1 }
  0x2c   :  { %2082 = sst [smem:[#allocation13_spill]] %s1268_s11 }
  0x2d   :  { %2083 = sst [smem:[#allocation14_spill]] %s1270_s12  ;;  %v287_v36 = vadd.f32 %v285_v20, %v277_v19 }
  0x2e   :  { %s1276_s16 = sld [smem:[#allocation2 + $0x1b]]  ;;  %v318_v55 = vstv %s1272_s13 }
  0x2f   :  { %s1278_s15 = sld [smem:[#allocation2 + $0x1c]]  ;;  %v289_v51 = vrot.slane %v287_v36, 2 }
  0x30   :  { %2084 = sst [smem:[#allocation15_spill]] %s1274_s14 }
  0x31   :  { %s1280_s2 = sld [smem:[#allocation2 + $0x1d]]  ;;  %v1374_v3 = vadd.f32 %v289_v51, %v283_v50 }
  0x32   :  { %s1282_s0 = sld [smem:[#allocation2 + $0x1e]] }
  0x33   :  { %s1284_s10 = sld [smem:[#allocation2 + $0x1f]] }
  0x34   :  { %2085 = sst [smem:[#allocation16_spill]] %s1276_s16 }
  0x35   :  { %s1286_s11 = sld [smem:[#allocation2 + $0x20]]  ;;  %v336_v42 = vstv %s1278_s15 }
  0x36   :  { %s1288_s12 = sld [smem:[#allocation2 + $0x21]]  ;;  %v337_v56 = vmul.f32 %v336_v42, %v1220_v0 }
  0x37   :  { %s1292_s16 = sld [smem:[#allocation2 + $0x22]]  ;;  %v338_v27 = vstv %s1280_s2 }
  0x38   :  { %s1295_s23 = sld [smem:[#allocation2 + $0x23]]  ;;  %v340_v32 = vstv %s1282_s0  ;;  %v339_v40 = vmul.f32 %v338_v27, %v1220_v0 }
  0x39   :  { %s1297_s14 = sld [smem:[#allocation2 + $0x24]]  ;;  %v342_v16 = vstv %s1284_s10  ;;  %v341_v43 = vmul.f32 %v340_v32, %v1220_v0 }
  0x3a   :  { %s1301_s21 = sld [smem:[#allocation2 + $0x25]]  ;;  %v343_v28 = vmul.f32 %v342_v16, %v1220_v0  ;;  %v345_v57 = vrot.slane %v339_v40, 1 }
  0x3b   :  { %s1306_s7 = sld [smem:[#allocation2 + $0x26]]  ;;  %v356_v63 = vstv %s1286_s11 }
  0x3c   :  { %s1309_s22 = sld [smem:[#allocation2 + $0x27]]  ;;  %v349_v44 = vrot.slane %v343_v28, 1  ;;  %v358_v1 = vstv %s1288_s12  ;;  %v347_v7 = vadd.f32 %v345_v57, %v337_v56 }
  0x3d   :  { %s1320_s20 = sld [smem:[#allocation2 + $0x29]]  ;;  %v360_v5 = vstv %s1292_s16 }
  0x3e   :  { %s1324_s5 = sld [smem:[#allocation2 + $0x30]]  ;;  %v351_v60 = vadd.f32 %v349_v44, %v341_v43  ;;  %v362_v8 = vstv %s1295_s23 }
  0x3f   :  { %2086 = sst [smem:[#allocation17_spill]] %s1297_s14 }
  0x40   :  { %s1315_s14 = sld [smem:[#allocation2 + $0x2b]]  ;;  %v353_v11 = vrot.slane %v351_v60, 2  ;;  %v382_v16 = vstv %s1301_s21 }
  0x41   :  { %s1330_s6 = sld [smem:[#allocation2 + $0x2a]]  ;;  %v384_v18 = vstv %s1306_s7 }
  0x42   :  { %s1336_s10 = sld [smem:[#allocation2 + $0x31]]  ;;  %v386_v20 = vstv %s1309_s22  ;;  %v1406_v40 = vadd.f32 %v353_v11, %v347_v7 }
  0x43   :  { %s1340_s2 = sld [smem:[#allocation2 + $0x28]]  ;;  %v402_v61 = vstv %s1320_s20 }
  0x44   :  { %s2087_s4 = sld [smem:[#allocation12_spill]]  ;;  %v249_v58 = vstv %s1324_s5  ;;  %v403_v10 = vmul.f32 %v402_v61, %v1220_v0 }
  0x45   :  { %s2088_s24 = sld [smem:[#allocation13_spill]] }
  0x46   :  { %s2089_s0 = sld [smem:[#allocation14_spill]]  ;;  %v406_v53 = vstv %s1315_s14  ;;  %v409_v36 = vrot.slane %v403_v10, 1 }
  0x47   :  { %s1344_s28 = sld [smem:[#allocation2 + $0x2c]]  ;;  %v407_v2 = vmul.f32 %v406_v53, %v1220_v0  ;;  %v404_v6 = vstv %s1330_s6 }
  0x48   :  { %s1349_s26 = sld [smem:[#allocation2 + $0x2d]]  ;;  %v313_v4 = vstv %s1336_s10  ;;  %v405_v21 = vmul.f32 %v404_v6, %v1220_v0 }
  0x49   :  { %s2090_s1 = sld [smem:[#allocation15_spill]]  ;;  %v400_v9 = vstv %s1340_s2  ;;  %v413_v22 = vrot.slane %v407_v2, 1 }
  0x4a   :  { %v296_v48 = vstv %s2087_s4  ;;  %s2091_s30 = sld [smem:[#allocation16_spill]]  ;;  %v401_v28 = vmul.f32 %v400_v9, %v1220_v0 }
  0x4b   :  { %v298_v49 = vstv %s2088_s24  ;;  %s1355_s18 = sld [smem:[#allocation2 + $0x2e]] }
  0x4c   :  { %v316_v52 = vstv %s2089_s0  ;;  %s1359_s15 = sld [smem:[#allocation2 + $0x2f]]  ;;  %v1433_v57 = vadd.f32 %v409_v36, %v401_v28 }
  0x4d   :  { %s1365_s8 = sld [smem:[#allocation2 + $0x32]]  ;;  %v420_v23 = vstv %s1344_s28 }
  0x4e   :  { %s2092_s4 = sld [smem:[#allocation17_spill]]  ;;  %v422_v32 = vstv %s1349_s26 }
  0x4f   :  { %v320_v59 = vstv %s2090_s1  ;;  %s1490_s16 = sld [smem:[#allocation2 + $0x33]]  ;;  %s2101_s1 = smov 127  }
  0x50   :  { %v322_v62 = vstv %s2091_s30  ;;  %s1528_s24 = sld [smem:[#allocation2 + $0x34]] }
  0x51   :  { %v424_v37 = vstv %s1355_s18  ;;  %s2102_s18 = smov 1   ;;  %s1530_s26 = sld [smem:[#allocation2 + $0x35]] }
  0x52   :  { %v426_v43 = vstv %s1359_s15  ;;  %s1532_s28 = sld [smem:[#allocation2 + $0x36]] }
  0x53   :  { %v377_v42 = vstv %s1365_s8  ;;  %s1534_s29 = sld [smem:[#allocation2 + $0x37]] }
  0x54   :  { %v380_v12 = vstv %s2092_s4  ;;  %s1536_s30 = sld [smem:[#allocation2 + $0x3c]] }
  0x55   :  { %s1538_s3 = sld [smem:[#allocation2 + $0x3d]] }
  0x56   :  { %s1540_s8 = sld [smem:[#allocation2 + $0x3e]] }
  0x57   :  { %s1542_s9 = sld [smem:[#allocation2 + $0x3f]] }
  0x58   :  { %s1544_s11 = sld [smem:[#allocation2 + $0x40]] }
  0x59   :  { %s1546_s12 = sld [smem:[#allocation2 + $0x41]] }
  0x5a   :  { %s1548_s13 = sld [smem:[#allocation2 + $0x42]] }
  0x5b   :  { %s1550_s23 = sld [smem:[#allocation2 + $0x43]] }
  0x5c   :  { %s1552_s21 = sld [smem:[#allocation2 + $0x44]] }
  0x5d   :  { %s1554_s7 = sld [smem:[#allocation2 + $0x45]] }
  0x5e   :  { %s1556_s22 = sld [smem:[#allocation2 + $0x46]] }
  0x5f   :  { %s1558_s5 = sld [smem:[#allocation2 + $0x47]] }
  0x60   :  { %s1560_s10 = sld [smem:[#allocation2 + $0x4c]] }
  0x61   :  { %2103 = sst [smem:[#allocation13_spill]] %s1550_s23 }
  0x62   :  { %s1562_s4 = sld [smem:[#allocation2 + $0x4d]] }
  0x63   :  { %s1564_s0 = sld [smem:[#allocation2 + $0x4e]] }
  0x64   :  { %s1566_s15 = sld [smem:[#allocation2 + $0x4f]] }
  0x65   :  { %s1568_s14 = sld [smem:[#allocation2 + $0x54]] }
  0x66   :  { %s1570_s20 = sld [smem:[#allocation2 + $0x55]] }
  0x67   :  { %s1572_s6 = sld [smem:[#allocation2 + $0x56]] }
  0x68   :  { %s1574_s2 = sld [smem:[#allocation2 + $0x57]] }
  0x69   :  { %s1576_s17 = sld [smem:[#allocation2 + $0x58]] }
  0x6a   :  { %s1578_s19 = sld [smem:[#allocation2 + $0x59]] }
  0x6b   :  { %2104 = sst [smem:[#allocation14_spill]] %s1568_s14 }
  0x6c   :  { %s1580_s25 = sld [smem:[#allocation2 + $0x5a]] }
  0x6d   :  { %s1582_s27 = sld [smem:[#allocation2 + $0x5b]] }
  0x6e   :  { %s1590_s14 = sld [smem:[#allocation2 + $0x5f]] }
  0x6f   :  { %2105 = sst [smem:[#allocation15_spill]] %s1576_s17 }
  0x70   :  { %2106 = sst [smem:[#allocation16_spill]] %s1578_s19 }
  0x71   :  { %s1592_s23 = sld [smem:[#allocation2 + $0x64]] }
  0x72   :  { %2107 = sst [smem:[#allocation17_spill]] %s1580_s25 }
  0x73   :  { %2108 = sst [smem:[#allocation6_spill]] %s1582_s27 }
  0x74   :  { %s1594_s17 = sld [smem:[#allocation2 + $0x65]] }
  0x75   :  { %s1596_s25 = sld [smem:[#allocation2 + $0x66]] }
  0x76   :  { %s1598_s19 = sld [smem:[#allocation2 + $0x67]] }
  0x77   :  { %2111 = sst [smem:[#allocation10_spill]] %s1592_s23 }
  0x78   :  { %s1601_s27 = sld [smem:[#allocation2 + $0x6c]] }
  0x79   :  { %s1611_s23 = sld [smem:[#allocation2 + $0x6f]] }
  0x7b   :  { %v179_v45 = vpop.permute.xlu0 %178 }
  0x83   :  { %v182_v19 = vpop.permute.xlu0 %181 }
  0x84   :  { %v1389_v24 = vsel %vm184_vm0, %v179_v45, %v182_v19  ;;  %v1392_v27 = vsel %vm186_vm1, %v179_v45, %v182_v19  ;;  %v1416_v45 = vadd.f32 %v413_v22, %v405_v21 }
  0x85   :  { %v191_v34 = vmul.f32 %v190_v14, %v1389_v24  ;;  %v195_v35 = vmul.f32 %v194_v17, %v1389_v24  ;;  %v235_v38 = vmul.f32 %v234_v30, %v1392_v27  ;;  %v231_v14 = vmul.f32 %v230_v26, %v1392_v27 }
  0x86   :  { %v255_v17 = vmul.f32 %v254_v33, %v1389_v24  ;;  %v193_v50 = vmul.f32 %v192_v15, %v1389_v24  ;;  %v259_v53 = vmul.f32 %v258_v41, %v1389_v24  ;;  %v189_v56 = vmul.f32 %v188_v13, %v1389_v24 }
  0x87   :  { %v201_v44 = vrot.slane %v195_v35, 1  ;;  %v197_v30 = vrot.slane %v191_v34, 1  ;;  %v241_v51 = vrot.slane %v235_v38, 1  ;;  %v233_v26 = vmul.f32 %v232_v29, %v1392_v27 }
  0x88   :  { %v257_v33 = vmul.f32 %v256_v39, %v1389_v24  ;;  %v261_v60 = vrot.slane %v255_v17, 1  ;;  %v265_v61 = vrot.slane %v259_v53, 1  ;;  %v295_v2 = vmul.f32 %v294_v47, %v1392_v27 }
  0x89   :  { %v203_v15 = vadd.f32 %v201_v44, %v193_v50  ;;  %v229_v13 = vmul.f32 %v228_v25, %v1392_v27  ;;  %v237_v41 = vrot.slane %v231_v14, 1  ;;  %v299_v29 = vmul.f32 %v298_v49, %v1392_v27 }
  0x8a   :  { %v417_v39 = vrot.slane %v1416_v45, 2  ;;  %v199_v6 = vadd.f32 %v197_v30, %v189_v56  ;;  %v243_v7 = vadd.f32 %v241_v51, %v233_v26  ;;  %v253_v9 = vmul.f32 %v252_v31, %v1389_v24 }
  0x8b   :  { %v267_v10 = vadd.f32 %v265_v61, %v257_v33  ;;  %v297_v47 = vmul.f32 %v296_v48, %v1392_v27  ;;  %v301_v11 = vrot.slane %v295_v2, 1  ;;  %v305_v25 = vrot.slane %v299_v29, 1 }
  0x8c   :  { %v319_v19 = vmul.f32 %v318_v55, %v1389_v24  ;;  %v205_v49 = vrot.slane %v203_v15, 2  ;;  %v263_v21 = vadd.f32 %v261_v60, %v253_v9  ;;  %v323_v28 = vmul.f32 %v322_v62, %v1389_v24 }
  0x8d   :  { %v269_v22 = vrot.slane %v267_v10, 2  ;;  %v239_v31 = vadd.f32 %v237_v41, %v229_v13  ;;  %v293_v34 = vmul.f32 %v292_v46, %v1392_v27  ;;  %v307_v35 = vadd.f32 %v305_v25, %v297_v47 }
  0x8e   :  { %v321_v48 = vmul.f32 %v320_v59, %v1389_v24  ;;  %v325_v55 = vrot.slane %v319_v19, 1  ;;  %v329_v38 = vrot.slane %v323_v28, 1  ;;  %v359_v44 = vmul.f32 %v358_v1, %v1392_v27 }
  0x8f   :  { %v271_v36 = vadd.f32 %v269_v22, %v263_v21  ;;  %v245_v14 = vrot.slane %v243_v7, 2  ;;  %v303_v62 = vadd.f32 %v301_v11, %v293_v34  ;;  %v309_v17 = vrot.slane %v307_v35, 2 }
  0x90   :  { %v363_v46 = vmul.f32 %v362_v8, %v1392_v27  ;;  %v207_v45 = vadd.f32 %v205_v49, %v199_v6  ;;  %v317_v59 = vmul.f32 %v316_v52, %v1389_v24  ;;  %v331_v50 = vadd.f32 %v329_v38, %v321_v48 }
  0x91   :  { %v361_v30 = vmul.f32 %v360_v5, %v1392_v27  ;;  %v311_v51 = vadd.f32 %v309_v17, %v303_v62  ;;  %v365_v1 = vrot.slane %v359_v44, 1  ;;  %v383_v56 = vmul.f32 %v382_v16, %v1389_v24 }
  0x92   :  { %v369_v53 = vrot.slane %v363_v46, 1  ;;  %v312_v26 = vadd.f32 %v1374_v3, %v271_v36  ;;  %v327_v8 = vadd.f32 %v325_v55, %v317_v59  ;;  %v333_v33 = vrot.slane %v331_v50, 2 }
  0x93   :  { %v387_v52 = vmul.f32 %v386_v20, %v1389_v24  ;;  %v314_v15 = vadd.f32 %v313_v4, %v311_v51  ;;  %v357_v5 = vmul.f32 %v356_v63, %v1392_v27  ;;  %v385_v61 = vmul.f32 %v384_v18, %v1389_v24 }
  0x94   :  { %v371_v60 = vadd.f32 %v369_v53, %v361_v30  ;;  %v335_v3 = vadd.f32 %v333_v33, %v327_v8  ;;  %v389_v16 = vrot.slane %v383_v56, 1  ;;  %v423_v13 = vmul.f32 %v422_v32, %v1392_v27 }
  0x95   :  { %v393_v2 = vrot.slane %v387_v52, 1  ;;  %v247_v41 = vadd.f32 %v245_v14, %v239_v31  ;;  %v367_v20 = vadd.f32 %v365_v1, %v357_v5  ;;  %v427_v63 = vmul.f32 %v426_v43, %v1392_v27 }
  0x96   :  { %v373_v4 = vrot.slane %v371_v60, 2  ;;  %v315_v29 = vadd.f32 %v314_v15, %v312_v26  ;;  %v381_v18 = vmul.f32 %v380_v12, %v1389_v24  ;;  %v425_v7 = vmul.f32 %v424_v37, %v1392_v27 }
  0x97   :  { %v395_v6 = vadd.f32 %v393_v2, %v385_v61  ;;  %v376_v32 = vadd.f32 %v1406_v40, %v335_v3  ;;  %v429_v10 = vrot.slane %v423_v13, 1  ;;  %v433_v47 = vrot.slane %v427_v63, 1 }
  0x98   :  { %v375_v9 = vadd.f32 %v373_v4, %v367_v20  ;;  %v248_v11 = vadd.f32 %v1361_v54, %v207_v45  ;;  %v391_v25 = vadd.f32 %v389_v16, %v381_v18  ;;  %v419_v43 = vadd.f32 %v417_v39, %v1433_v57 }
  0x99   :  { %v397_v19 = vrot.slane %v395_v6, 2  ;;  %v250_v49 = vadd.f32 %v249_v58, %v247_v41  ;;  %v421_v21 = vmul.f32 %v420_v23, %v1392_v27  ;;  %v435_v37 = vadd.f32 %v433_v47, %v425_v7 }
  0x9a   :  { %v378_v12 = vadd.f32 %v377_v42, %v375_v9  ;;  %v445_v34 = vrot.slane %v315_v29, 7  ;;  %v441_v35 = vstv %s1490_s16  ;;  %s1584_s16 = sld [smem:[#allocation2 + $0x5c]]  ;;  %v488_v51 = vstv %s1534_s29 }
  0x9b   :  { %v399_v22 = vadd.f32 %v397_v19, %v391_v25  ;;  %v431_v40 = vadd.f32 %v429_v10, %v421_v21  ;;  %v437_v31 = vrot.slane %v435_v37, 2  ;;  %v251_v54 = vadd.f32 %v250_v49, %v248_v11  ;;  %s1615_s29 = sld [smem:[#allocation2 + $0x70]] }
  0x9c   :  { %v379_v28 = vadd.f32 %v378_v12, %v376_v32  ;;  %v484_v1 = vstv %s1530_s26  ;;  %v489_v53 = vmul.f32 %v488_v51, %v1389_v24  ;;  %v529_v56 = vstv %s1542_s9  ;;  %s1621_s26 = sld [smem:[#allocation2 + $0x71]] }
  0x9d   :  { %v439_v48 = vadd.f32 %v437_v31, %v431_v40  ;;  %v440_v36 = vadd.f32 %v419_v43, %v399_v22  ;;  %v454_v58 = vsel %vm453_vm2, %v251_v54, %v445_v34  ;;  %v570_v26 = vstv %s1558_s5  ;;  %s1627_s9 = sld [smem:[#allocation2 + $0x72]] }
  0x9e   :  { %v448_v55 = vrot.slane %v379_v28, 6  ;;  %v485_v8 = vmul.f32 %v484_v1, %v1389_v24  ;;  %v566_v33 = vstv %s1554_s7  ;;  %v482_v52 = vstv %s1528_s24  ;;  %s1632_s24 = sld [smem:[#allocation2 + $0x73]] }
  0x9f   :  { %v442_v57 = vadd.f32 %v441_v35, %v439_v48  ;;  %v486_v15 = vstv %s1532_s28  ;;  %v564_v5 = vstv %s1552_s21  ;;  %v568_v60 = vstv %s1556_s22  ;;  %s1637_s28 = sld [smem:[#allocation2 + $0x74]] }
  0xa0   :  { %v456_v39 = vsel %vm455_vm3, %v454_v58, %v448_v55  ;;  %2109 = sst [smem:[#allocation5_spill]] %s1584_s16  ;;  %v525_v61 = vstv %s1538_s3  ;;  %v527_v3 = vstv %s1540_s8  ;;  %v530_v16 = vmul.f32 %v529_v56, %v1220_v0 }
  0xa1   :  { %v443_v42 = vadd.f32 %v442_v57, %v440_v36  ;;  %s1606_s16 = sld [smem:[#allocation2 + $0x6e]]  ;;  %v571_v2 = vmul.f32 %v570_v26, %v1392_v27  ;;  %v503_v13 = vrot.slane %v489_v53, 1  ;;  %v567_v41 = vmul.f32 %v566_v33, %v1392_v27 }
  0xa2   :  { %v609_v20 = vstv %s1560_s10  ;;  %v611_v4 = vstv %s1562_s4  ;;  %v483_v63 = vmul.f32 %v482_v52, %v1389_v24  ;;  %v499_v29 = vrot.slane %v485_v8, 1  ;;  %s1643_s3 = sld [smem:[#allocation2 + $0x75]] }
  0xa3   :  { %v451_v23 = vrot.slane %v443_v42, 5  ;;  %v613_v18 = vstv %s1564_s0  ;;  %v615_v6 = vstv %s1566_s15  ;;  %v487_v7 = vmul.f32 %v486_v15, %v1389_v24  ;;  %s1647_s8 = sld [smem:[#allocation2 + $0x76]] }
  0xa4   :  { %v526_v9 = vmul.f32 %v525_v61, %v1220_v0  ;;  %v528_v32 = vmul.f32 %v527_v3, %v1220_v0  ;;  %v565_v10 = vmul.f32 %v564_v5, %v1392_v27  ;;  %v523_v47 = vstv %s1536_s30  ;;  %s1651_s21 = sld [smem:[#allocation2 + $0x77]] }
  0xa5   :  { %v458_v38 = vsel %vm457_vm4, %v456_v39, %v451_v23  ;;  %v544_v11 = vrot.slane %v530_v16, 1  ;;  %v585_v25 = vrot.slane %v571_v2, 1  ;;  %v656_v19 = vstv %s1574_s2  ;;  %s2112_s30 = sld [smem:[#allocation13_spill]] }
  0xa6   :  { %v460_v44 = vsel %vm459_vm5, %v458_v38, %v251_v54  ;;  %v505_v43 = vadd.f32 %v503_v13, %v487_v7  ;;  %v569_v49 = vmul.f32 %v568_v60, %v1392_v27  ;;  %v581_v12 = vrot.slane %v567_v41, 1  ;;  %s1656_s7 = sld [smem:[#allocation2 + $0x7c]] }
  0xa7   :  { %v462_v14 = vsel %vm461_vm6, %v460_v44, %v445_v34  ;;  %v616_v21 = vmul.f32 %v615_v6, %v1389_v24  ;;  %v501_v37 = vadd.f32 %v499_v29, %v483_v63  ;;  %v531_v22 = vstv %s1544_s11  ;;  %s1661_s22 = sld [smem:[#allocation2 + $0x7d]] }
  0xa8   :  { %v464_v62 = vsel %vm463_vm7, %v462_v14, %v448_v55  ;;  %v610_v28 = vmul.f32 %v609_v20, %v1389_v24  ;;  %v612_v40 = vmul.f32 %v611_v4, %v1389_v24  ;;  %v524_v31 = vmul.f32 %v523_v47, %v1220_v0  ;;  %s1665_s5 = sld [smem:[#allocation2 + $0x7e]] }
  0xa9   :  { %v466_v17 = vsel %vm465_vm8, %v464_v62, %v451_v23  ;;  %v533_v34 = vstv %s1546_s12  ;;  %v540_v35 = vrot.slane %v526_v9, 1  ;;  %v657_v54 = vmul.f32 %v656_v19, %v1220_v0  ;;  %s2114_s10 = sld [smem:[#allocation14_spill]] }
  0xaa   :  { %v468_v46 = vmin.f32 %v466_v17, 0.0  ;;  %vm467_vm9 = vcmp.gt.f32.partialorder %v466_v17, 0.0  ;;  %v546_v48 = vadd.f32 %v544_v11, %v528_v32  ;;  %v587_v36 = vadd.f32 %v585_v25, %v569_v49  ;;  %s1669_s4 = sld [smem:[#allocation2 + $0x7f]] }
  0xab   :  { %v652_v55 = vstv %s1570_s20  ;;  %v654_v57 = vstv %s1572_s6  ;;  %v515_v58 = vrot.slane %v505_v43, 2  ;;  %v535_v42 = vstv %s1548_s13  ;;  %s2115_s0 = sld [smem:[#allocation5_spill]] }
  0xac   :  { %v469_v45 = vmul.f32 1.442695, %v468_v46  ;;  %2113 = sst [smem:[#allocation7_spill]] %s1656_s7  ;;  %v537_v39 = vstv %s2112_s30  ;;  %v630_v23 = vrot.slane %v616_v21, 1  ;;  %v583_v38 = vadd.f32 %v581_v12, %v565_v10 }
  0xad   :  { %v614_v44 = vmul.f32 %v613_v18, %v1389_v24  ;;  %v626_v14 = vrot.slane %v612_v40, 1  ;;  %v697_v62 = vstv %s1590_s14  ;;  %s1673_s15 = sld [smem:[#allocation2 + $0x84]]  ;;  %v655_v46 = vmul.f32 %v654_v57, %v1220_v0 }
  0xae   :  { %1177 = vpow2.f32 %v469_v45  ;;  %v671_v45 = vrot.slane %v657_v54, 1  ;;  %s1678_s6 = sld [smem:[#allocation2 + $0x85]]  ;;  %v556_v51 = vrot.slane %v546_v48, 2  ;;  %v597_v1 = vrot.slane %v587_v36, 2 }
  0xaf   :  { %v650_v53 = vstv %s2114_s10  ;;  %s1681_s2 = sld [smem:[#allocation2 + $0x86]]  ;;  %v632_v56 = vadd.f32 %v630_v23, %v614_v44  ;;  %v698_v8 = vmul.f32 %v697_v62, %v1392_v27  ;;  %v738_v33 = vstv %s1594_s17 }
  0xb0   :  { %s2118_s14 = sld [smem:[#allocation6_spill]]  ;;  %v1688_v52 = vadd.f32 %v515_v58, %v501_v37  ;;  %v628_v15 = vadd.f32 %v626_v14, %v610_v28  ;;  %v651_v61 = vmul.f32 %v650_v53, %v1220_v0  ;;  %v673_v16 = vadd.f32 %v671_v45, %v655_v46 }
  0xb1   :  { %v691_v26 = vstv %s2115_s0  ;;  %s1686_s30 = sld [smem:[#allocation2 + $0x87]]  ;;  %v742_v2 = vstv %s1598_s19  ;;  %v739_v4 = vmul.f32 %v738_v33, %v1389_v24  ;;  %v1705_v63 = vadd.f32 %v597_v1, %v583_v38 }
  0xb2   :  { %s1692_s7 = sld [smem:[#allocation2 + $0x88]]  ;;  %v692_v20 = vmul.f32 %v691_v26, %v1392_v27  ;;  %v642_v29 = vrot.slane %v632_v56, 2  ;;  %v712_v6 = vrot.slane %v698_v8, 1  ;;  %v743_v10 = vmul.f32 %v742_v2, %v1389_v24 }
  0xb3   :  { %2116 = sst [smem:[#allocation9_spill]] %s1673_s15  ;;  %v683_v19 = vrot.slane %v673_v16, 2  ;;  %v740_v12 = vstv %s1596_s25  ;;  %v753_v21 = vrot.slane %v739_v4, 1  ;;  %v818_v40 = vstv %s1637_s28 }
  0xb4   :  { %v1178_v59 = vpop.eup %1177  ;;  %s2121_s10 = sld [smem:[#allocation10_spill]]  ;;  %v1724_v37 = vadd.f32 %v642_v29, %v628_v15  ;;  %v757_v36 = vrot.slane %v743_v10, 1  ;;  %v1745_v38 = vmul.f32 %v818_v40, %v1392_v27  ;;  %v791_v56 = vstv %s1632_s24 }
  0xb5   :  { %v1172_v50 = vadd.f32 -1.0, %v1178_v59  ;;  %s1696_s0 = sld [smem:[#allocation2 + $0x89]]  ;;  %v824_v15 = vstv %s1651_s21  ;;  %v781_v16 = vstv %s1606_s16  ;;  %v785_v2 = vstv %s1615_s29 }
  0xb6   :  { %v664_v41 = vstv %s2118_s14  ;;  %s1703_s17 = sld [smem:[#allocation2 + $0x8a]]  ;;  %v782_v10 = vmul.f32 %v781_v16, %v1220_v0 }
  0xb7   :  { %v1522_v30 = vsel %vm467_vm9, %v466_v17, %v1172_v50  ;;  %v653_v17 = vmul.f32 %v652_v55, %v1220_v0  ;;  %v542_v50 = vadd.f32 %v540_v35, %v524_v31  ;;  %s1708_s19 = sld [smem:[#allocation2 + $0x8b]]  ;;  %v820_v31 = vstv %s1643_s3 }
  0xb8   :  { %474 = vrot.lane.b32.xlu1 %v1522_v30, %s2101_s1  ;;  %s1586_s1 = sld [smem:[#allocation2 + $0x5d]]  ;;  %v538_v47 = vmul.f32 %v537_v39, %v1522_v30  ;;  %v665_v11 = vmul.f32 %v664_v41, %v1522_v30  ;;  %v534_v35 = vmul.f32 %v533_v34, %v1522_v30  ;;  %v741_v39 = vmul.f32 %v740_v12, %v1389_v24 }
  0xb9   :  { %2120 = sst [smem:[#allocation12_spill]] %s1692_s7  ;;  %v667_v3 = vrot.slane %v653_v17, 1  ;;  %v1698_v13 = vadd.f32 %v556_v51, %v542_v50  ;;  %v1748_v44 = vmul.f32 %v820_v31, %v1392_v27  ;;  %v536_v14 = vmul.f32 %v535_v42, %v1522_v30 }
  0xba   :  { %s2123_s7 = sld [smem:[#allocation17_spill]]  ;;  %v736_v32 = vstv %s2121_s10  ;;  %v552_v55 = vrot.slane %v538_v47, 1  ;;  %v679_v57 = vrot.slane %v665_v11, 1  ;;  %v548_v45 = vrot.slane %v534_v35, 1 }
  0xbb   :  { %s1713_s14 = sld [smem:[#allocation2 + $0x8c]]  ;;  %v669_v25 = vadd.f32 %v667_v3, %v651_v61  ;;  %v737_v48 = vmul.f32 %v736_v32, %v1389_v24  ;;  %v783_v50 = vstv %s1611_s23  ;;  %v822_v51 = vstv %s1647_s8 }
  0xbc   :  { %s1722_s15 = sld [smem:[#allocation2 + $0x8e]]  ;;  %v554_v1 = vadd.f32 %v552_v55, %v536_v14  ;;  %v787_v42 = vstv %s1621_s26  ;;  %v532_v26 = vmul.f32 %v531_v22, %v1522_v30  ;;  %v777_v61 = vstv %s1601_s27 }
  0xbd   :  { %s1728_s10 = sld [smem:[#allocation2 + $0x8f]]  ;;  %v1736_v58 = vadd.f32 %v683_v19, %v669_v25  ;;  %v1742_v34 = vadd.f32 %v753_v21, %v737_v48  ;;  %v784_v3 = vmul.f32 %v783_v50, %v1220_v0  ;;  %v788_v22 = vmul.f32 %v787_v42, %v1522_v30 }
  0xbe   :  { %v693_v59 = vstv %s1586_s1  ;;  %s2119_s1 = sld [smem:[#allocation15_spill]]  ;;  %v792_v41 = vmul.f32 %v791_v56, %v1522_v30  ;;  %v560_v4 = vrot.slane %v554_v1, 2  ;;  %v786_v47 = vmul.f32 %v785_v2, %v1522_v30 }
  0xbf   :  { %v694_v5 = vmul.f32 %v693_v59, %v1392_v27  ;;  %s1734_s25 = sld [smem:[#allocation2 + $0x38]]  ;;  %v1759_v59 = vadd.f32 %v757_v36, %v741_v39  ;;  %v798_v11 = vrot.slane %v784_v3, 1  ;;  %v910_v25 = vstv %s1686_s30 }
  0xc0   :  { %477 = vrot.lane.b32.xlu1 %v1522_v30, %s2102_s18  ;;  %s1588_s18 = sld [smem:[#allocation2 + $0x5e]]  ;;  %v662_v49 = vstv %s2123_s7  ;;  %v802_v19 = vrot.slane %v788_v22, 1  ;;  %v918_v12 = vstv %s1708_s19  ;;  %v823_v31 = vmul.f32 %v822_v51, %v1392_v27 }
  0xc1   :  { %v708_v9 = vrot.slane %v694_v5, 1  ;;  %s1739_s28 = sld [smem:[#allocation2 + $0x39]]  ;;  %v663_v62 = vmul.f32 %v662_v49, %v1522_v30  ;;  %v825_v49 = vmul.f32 %v824_v15, %v1392_v27  ;;  %v911_v48 = vmul.f32 %v910_v25, %v1220_v0 }
  0xc2   :  { %s1750_s12 = sld [smem:[#allocation2 + $0x3a]]  ;;  %v800_v55 = vadd.f32 %v798_v11, %v782_v10  ;;  %v908_v39 = vstv %s1681_s2  ;;  %v804_v14 = vadd.f32 %v802_v19, %v786_v47  ;;  %v914_v50 = vstv %s1696_s0 }
  0xc3   :  { %v710_v54 = vadd.f32 %v708_v9, %v692_v20  ;;  %s1757_s3 = sld [smem:[#allocation2 + $0x3b]]  ;;  %v681_v53 = vadd.f32 %v679_v57, %v663_v62  ;;  %v550_v20 = vadd.f32 %v548_v45, %v532_v26  ;;  %v789_v9 = vstv %s1627_s9 }
  0xc4   :  { %v658_v18 = vstv %s2119_s1  ;;  %s1717_s1 = sld [smem:[#allocation2 + $0x8d]]  ;;  %v790_v40 = vmul.f32 %v789_v9, %v1522_v30  ;;  %v951_v36 = vstv %s1728_s10  ;;  %v906_v57 = vstv %s1678_s6 }
  0xc5   :  { %s1763_s7 = sld [smem:[#allocation2 + $0x48]]  ;;  %v659_v5 = vmul.f32 %v658_v18, %v1522_v30  ;;  %v687_v29 = vrot.slane %v681_v53, 2  ;;  %v769_v18 = vrot.slane %v1759_v59, 2  ;;  %v1805_v21 = vadd.f32 %v560_v4, %v550_v20 }
  0xc6   :  { %2110 = sst [smem:[#allocation8_spill]] %s1588_s18  ;;  %v952_v51 = vmul.f32 %v951_v36, %v1392_v27  ;;  %v916_v42 = vstv %s1703_s17  ;;  %v925_v56 = vrot.slane %v911_v48, 1  ;;  %v810_v26 = vrot.slane %v800_v55, 2 }
  0xc7   :  { %s1604_s18 = sld [smem:[#allocation2 + $0x6d]]  ;;  %v915_v22 = vmul.f32 %v914_v50, %v1522_v30  ;;  %v949_v20 = vstv %s1722_s15  ;;  %v945_v19 = vstv %s1713_s14 }
  0xc8   :  { %s2117_s20 = sld [smem:[#allocation8_spill]] }
  0xc9   :  { %s1767_s13 = sld [smem:[#allocation2 + $0x49]]  ;;  %v496_v50 = vstv %s1757_s3 }
  0xca   :  { %s1781_s23 = sld [smem:[#allocation2 + $0x4b]]  ;;  %v947_v16 = vstv %s1717_s1 }
  0xcb   :  { %s1787_s11 = sld [smem:[#allocation2 + $0x50]] }
  0xcc   :  { %s1790_s27 = sld [smem:[#allocation2 + $0x51]] }
  0xcd   :  { %v779_v46 = vstv %s1604_s18  ;;  %s1774_s18 = sld [smem:[#allocation2 + $0x4a]] }
  0xce   :  { %v695_v60 = vstv %s2117_s20  ;;  %s2122_s20 = sld [smem:[#allocation16_spill]]  ;;  %v780_v33 = vmul.f32 %v779_v46, %v1220_v0  ;;  %v839_v46 = vrot.slane %v825_v49, 1 }
  0xcf   :  { %v696_v7 = vmul.f32 %v695_v60, %v1392_v27  ;;  %s1794_s16 = sld [smem:[#allocation2 + $0x52]] }
  0xd0   :  { %v794_v32 = vrot.slane %v780_v33, 1  ;;  %s1799_s29 = sld [smem:[#allocation2 + $0x53]] }
  0xd1   :  { %v714_v28 = vadd.f32 %v712_v6, %v696_v7  ;;  %v778_v7 = vmul.f32 %v777_v61, %v1220_v0  ;;  %s1803_s26 = sld [smem:[#allocation2 + $0x60]]  ;;  %v865_v0 = vstv %s1661_s22  ;;  %v841_v61 = vadd.f32 %v839_v46, %v823_v31 }
  0xd2   :  { %s1811_s9 = sld [smem:[#allocation2 + $0x61]]  ;;  %v866_v3 = vmul.f32 %v865_v0, %v1389_v24  ;;  %v1868_v31 = vmul.f32 %v947_v16, %v1392_v27  ;;  %v494_v0 = vstv %s1750_s12 }
  0xd3   :  { %v724_v17 = vrot.slane %v714_v28, 2  ;;  %v796_v35 = vadd.f32 %v794_v32, %v778_v7  ;;  %s1816_s24 = sld [smem:[#allocation2 + $0x62]]  ;;  %v966_v7 = vrot.slane %v952_v51, 1  ;;  %v851_v49 = vrot.slane %v841_v61, 2 }
  0xd4   :  { %v660_v43 = vstv %s2122_s20  ;;  %s1821_s8 = sld [smem:[#allocation2 + $0x63]]  ;;  %v572_v51 = vstv %s1763_s7 }
  0xd5   :  { %v661_v23 = vmul.f32 %v660_v43, %v1522_v30  ;;  %v1777_v60 = vadd.f32 %v724_v17, %v710_v54  ;;  %v806_v43 = vrot.slane %v792_v41, 1  ;;  %v869_v54 = vstv %s1669_s4  ;;  %s2124_s21 = sld [smem:[#allocation9_spill]] }
  0xd6   :  { %v835_v17 = vrot.slane %v1748_v44, 1  ;;  %s1824_s4 = sld [smem:[#allocation2 + $0x68]]  ;;  %v870_v45 = vmul.f32 %v869_v54, %v1389_v24  ;;  %v917_v41 = vmul.f32 %v916_v42, %v1522_v30  ;;  %v812_v9 = vadd.f32 %v810_v26, %v796_v35 }
  0xd7   :  { %v675_v8 = vrot.slane %v661_v23, 1  ;;  %v919_v23 = vmul.f32 %v918_v12, %v1522_v30  ;;  %v808_v62 = vadd.f32 %v806_v43, %v790_v40  ;;  %s1830_s6 = sld [smem:[#allocation2 + $0x69]]  ;;  %v950_v43 = vmul.f32 %v949_v20, %v1392_v27 }
  0xd8   :  { %s2125_s20 = sld [smem:[#allocation18_spill]]  ;;  %v884_v2 = vrot.slane %v870_v45, 1  ;;  %v880_v12 = vrot.slane %v866_v3, 1  ;;  %v929_v40 = vrot.slane %v915_v22, 1  ;;  %v837_v55 = vadd.f32 %v835_v17, %v1745_v38 }
  0xd9   :  { %v677_v6 = vadd.f32 %v675_v8, %v659_v5  ;;  %s1840_s22 = sld [smem:[#allocation2 + $0x6a]]  ;;  %v867_v8 = vstv %s1665_s5  ;;  %v933_v15 = vrot.slane %v919_v23, 1  ;;  %v814_v5 = vrot.slane %v808_v62, 2 }
  0xda   :  { %s1844_s0 = sld [smem:[#allocation2 + $0x6b]]  ;;  %v868_v10 = vmul.f32 %v867_v8, %v1389_v24  ;;  %v1874_v36 = vadd.f32 %v966_v7, %v950_v43  ;;  %v1885_v62 = vadd.f32 %v1805_v21, %v1698_v13  ;;  %v1903_v13 = vadd.f32 %v851_v49, %v837_v55 }
  0xdb   :  { %v1807_v28 = vadd.f32 %v687_v29, %v677_v6  ;;  %v904_v33 = vstv %s2124_s21  ;;  %s2126_s19 = sld [smem:[#allocation7_spill]]  ;;  %v935_v47 = vadd.f32 %v933_v15, %v917_v41  ;;  %v816_v11 = vadd.f32 %v814_v5, %v804_v14 }
  0xdc   :  { %s1848_s10 = sld [smem:[#allocation2 + $0x78]]  ;;  %v1872_v35 = vadd.f32 %v884_v2, %v868_v10  ;;  %v492_v17 = vstv %s1739_s28  ;;  %v578_v42 = vstv %s1781_s23  ;;  %v617_v26 = vstv %s1787_s11 }
  0xdd   :  { %s2127_s17 = sld [smem:[#allocation12_spill]]  ;;  %v941_v23 = vrot.slane %v935_v47, 2  ;;  %v1889_v46 = vadd.f32 %v1807_v28, %v1736_v58  ;;  %v1901_v38 = vadd.f32 %v816_v11, %v812_v9  ;;  %v490_v28 = vstv %s1734_s25 }
  0xde   :  { %v1835_v1 = vld [vmem:[%s2125_s20] sm:$0xff]  ;;  %s1853_s5 = sld [smem:[#allocation2 + $0x79]]  ;;  %v619_v8 = vstv %s1790_s27  ;;  %v623_v15 = vstv %s1799_s29  ;;  %v699_v5 = vstv %s1803_s26 }
  0xdf   :  { %v907_v44 = vmul.f32 %v1835_v1, %v906_v57  ;;  %v909_v53 = vmul.f32 %v1835_v1, %v908_v39  ;;  %v905_v4 = vmul.f32 %v1835_v1, %v904_v33  ;;  %s1856_s21 = sld [smem:[#allocation2 + $0x7a]]  ;;  %v621_v33 = vstv %s1794_s16 }
  0xe0   :  { %s1860_s1 = sld [smem:[#allocation2 + $0x7b]]  ;;  %v701_v61 = vstv %s1811_s9  ;;  %v703_v3 = vstv %s1816_s24  ;;  %v705_v16 = vstv %s1821_s8  ;;  %v744_v22 = vstv %s1824_s4 }
  0xe1   :  { %v921_v29 = vrot.slane %v907_v44, 1  ;;  %v927_v6 = vadd.f32 %v925_v56, %v909_v53  ;;  %v863_v32 = vstv %s2126_s19  ;;  %s1865_s15 = sld [smem:[#allocation2 + $0x94]]  ;;  %v574_v44 = vstv %s1767_s13 }
  0xe2   :  { %s1870_s2 = sld [smem:[#allocation2 + $0x80]]  ;;  %v864_v57 = vmul.f32 %v863_v32, %v1389_v24  ;;  %v1894_v24 = vadd.f32 %v769_v18, %v1742_v34  ;;  %v576_v53 = vstv %s1774_s18  ;;  %v746_v20 = vstv %s1830_s6 }
  0xe3   :  { %v912_v25 = vstv %s2127_s17  ;;  %v923_v54 = vadd.f32 %v921_v29, %v905_v4  ;;  %v937_v48 = vrot.slane %v927_v6, 2  ;;  %s1876_s30 = sld [smem:[#allocation2 + $0x95]]  ;;  %v748_v4 = vstv %s1840_s22 }
  0xe4   :  { %v913_v39 = vmul.f32 %v912_v25, %v1522_v30  ;;  %s1881_s14 = sld [smem:[#allocation2 + $0x81]]  ;;  %v1897_v30 = vmul.f32 %v945_v19, %v1392_v27  ;;  %v1905_v58 = vadd.f32 %v880_v12, %v864_v57  ;;  %v750_v29 = vstv %s1844_s0 }
  0xe5   :  { %s1899_s20 = sld [smem:[#allocation2 + $0x82]]  ;;  %v1910_v27 = vadd.f32 %v937_v48, %v923_v54  ;;  %v826_v6 = vstv %s1848_s10  ;;  %v828_v32 = vstv %s1853_s5  ;;  %v830_v10 = vstv %s1856_s21 }
  0xe6   :  { %v931_v21 = vadd.f32 %v929_v40, %v913_v39  ;;  %s1907_s19 = sld [smem:[#allocation2 + $0x83]]  ;;  %v832_v25 = vstv %s1860_s1 }
  0xe7   :  { %s1914_s17 = sld [smem:[#allocation2 + $0x90]] }
  0xe8   :  { %v1919_v45 = vadd.f32 %v941_v23, %v931_v21  ;;  %s1933_s25 = sld [smem:[#allocation2 + $0x93]]  ;;  %v871_v19 = vstv %s1870_s2 }
  0xe9   :  { %v733_v2 = vstv %s1876_s30  ;;  %s1989_s3 = sld [smem:[#allocation2 + $0x96]] }
  0xea   :  { %v873_v49 = vstv %s1881_s14  ;;  %s2011_s7 = sld [smem:[#allocation2 + $0x97]] }
  0xeb   :  { %v875_v12 = vstv %s1899_s20  ;;  %s2138_s23 = sld [smem:[#allocation19_spill]] }
  0xec   :  { %2128 = sst [smem:[#allocation11_spill]] %s1907_s19 }
  0xed   :  { %2129 = sst [smem:[#allocation13_spill]] %s1914_s17 }
  0xee   :  { %s1921_s19 = sld [smem:[#allocation2 + $0x91]] }
  0xef   :  { %s1927_s17 = sld [smem:[#allocation2 + $0x92]] }
  0xf0   :  { %s2130_s28 = sld [smem:[#allocation11_spill]] }
  0xf1   :  { %s2131_s12 = sld [smem:[#allocation13_spill]] }
  0xf4   :  { %v955_v57 = vstv %s1921_s19 }
  0xf6   :  { %v877_v40 = vstv %s2130_s28 }
 0x12a   :  { %v475_v14 = vpop.permute.xlu1 %474 }
 0x132   :  { %v478_v41 = vpop.permute.xlu1 %477 }
 0x133   :  { %v1948_v7 = vsel %vm184_vm0, %v475_v14, %v478_v41  ;;  %v1951_v9 = vsel %vm186_vm1, %v475_v14, %v478_v41 }
 0x134   :  { %v493_v47 = vmul.f32 %v492_v17, %v1948_v7  ;;  %v497_v11 = vmul.f32 %v496_v50, %v1948_v7  ;;  %v579_v43 = vmul.f32 %v578_v42, %v1951_v9  ;;  %v575_v54 = vmul.f32 %v574_v44, %v1951_v9 }
 0x135   :  { %v620_v48 = vmul.f32 %v619_v8, %v1948_v7  ;;  %v624_v14 = vmul.f32 %v623_v15, %v1948_v7  ;;  %v495_v17 = vmul.f32 %v494_v0, %v1948_v7  ;;  %v577_v41 = vmul.f32 %v576_v53, %v1951_v9 }
 0x136   :  { %v511_v39 = vrot.slane %v497_v11, 1  ;;  %v593_v23 = vrot.slane %v579_v43, 1  ;;  %v507_v50 = vrot.slane %v493_v47, 1  ;;  %v959_v42 = vstv %s1933_s25 }
 0x137   :  { %v622_v18 = vmul.f32 %v621_v33, %v1948_v7  ;;  %v634_v56 = vrot.slane %v620_v48, 1  ;;  %v638_v59 = vrot.slane %v624_v14, 1  ;;  %v702_v44 = vmul.f32 %v701_v61, %v1951_v9 }
 0x138   :  { %v491_v8 = vmul.f32 %v490_v28, %v1948_v7  ;;  %v573_v11 = vmul.f32 %v572_v51, %v1951_v9  ;;  %v589_v43 = vrot.slane %v575_v54, 1  ;;  %v706_v15 = vmul.f32 %v705_v16, %v1951_v9 }
 0x139   :  { %v513_v34 = vadd.f32 %v511_v39, %v495_v17  ;;  %v595_v55 = vadd.f32 %v593_v23, %v577_v41  ;;  %v618_v0 = vmul.f32 %v617_v26, %v1948_v7  ;;  %v640_v47 = vadd.f32 %v638_v59, %v622_v18 }
 0x13a   :  { %v704_v53 = vmul.f32 %v703_v3, %v1951_v9  ;;  %v716_v21 = vrot.slane %v702_v44, 1  ;;  %v720_v33 = vrot.slane %v706_v15, 1  ;;  %v747_v48 = vmul.f32 %v746_v20, %v1948_v7 }
 0x13b   :  { %v509_v14 = vadd.f32 %v507_v50, %v491_v8  ;;  %v636_v61 = vadd.f32 %v634_v56, %v618_v0  ;;  %v646_v28 = vrot.slane %v640_v47, 2  ;;  %v751_v51 = vmul.f32 %v750_v29, %v1948_v7 }
 0x13c   :  { %v591_v54 = vadd.f32 %v589_v43, %v573_v11  ;;  %v700_v16 = vmul.f32 %v699_v5, %v1951_v9  ;;  %v722_v39 = vadd.f32 %v720_v33, %v704_v53  ;;  %v749_v26 = vmul.f32 %v748_v4, %v1948_v7 }
 0x13d   :  { %v648_v59 = vadd.f32 %v646_v28, %v636_v61  ;;  %v761_v18 = vrot.slane %v747_v48, 1  ;;  %v765_v3 = vrot.slane %v751_v51, 1  ;;  %v829_v23 = vmul.f32 %v828_v32, %v1951_v9 }
 0x13e   :  { %v519_v20 = vrot.slane %v513_v34, 2  ;;  %v601_v17 = vrot.slane %v595_v55, 2  ;;  %v718_v56 = vadd.f32 %v716_v21, %v700_v16  ;;  %v728_v50 = vrot.slane %v722_v39, 2 }
 0x13f   :  { %v649_v41 = vadd.f32 %v648_v59, %v1724_v37  ;;  %v745_v29 = vmul.f32 %v744_v22, %v1948_v7  ;;  %v767_v5 = vadd.f32 %v765_v3, %v749_v26  ;;  %v833_v44 = vmul.f32 %v832_v25, %v1951_v9 }
 0x140   :  { %v730_v4 = vadd.f32 %v728_v50, %v718_v56  ;;  %v827_v32 = vmul.f32 %v826_v6, %v1951_v9  ;;  %v843_v8 = vrot.slane %v829_v23, 1  ;;  %v874_v34 = vmul.f32 %v873_v49, %v1948_v7 }
 0x141   :  { %v763_v55 = vadd.f32 %v761_v18, %v745_v29  ;;  %v773_v37 = vrot.slane %v767_v5, 2  ;;  %v831_v22 = vmul.f32 %v830_v10, %v1951_v9  ;;  %v847_v21 = vrot.slane %v833_v44, 1 }
 0x142   :  { %v521_v11 = vadd.f32 %v519_v20, %v509_v14  ;;  %v603_v25 = vadd.f32 %v601_v17, %v591_v54  ;;  %v731_v43 = vadd.f32 %v730_v4, %v1777_v60  ;;  %v878_v15 = vmul.f32 %v877_v40, %v1948_v7 }
 0x143   :  { %v732_v6 = vadd.f32 %v1889_v46, %v649_v41  ;;  %v775_v0 = vadd.f32 %v773_v37, %v763_v55  ;;  %v845_v47 = vadd.f32 %v843_v8, %v827_v32  ;;  %v849_v49 = vadd.f32 %v847_v21, %v831_v22 }
 0x144   :  { %v876_v53 = vmul.f32 %v875_v12, %v1948_v7  ;;  %v888_v33 = vrot.slane %v874_v34, 1  ;;  %v892_v10 = vrot.slane %v878_v15, 1  ;;  %v956_v48 = vmul.f32 %v955_v57, %v1951_v9 }
 0x145   :  { %v734_v60 = vadd.f32 %v733_v2, %v731_v43  ;;  %v776_v40 = vadd.f32 %v775_v0, %v1894_v24  ;;  %v855_v14 = vrot.slane %v849_v49, 2  ;;  %v960_v46 = vmul.f32 %v959_v42, %v1951_v9 }
 0x146   :  { %v522_v61 = vadd.f32 %v521_v11, %v1688_v52  ;;  %v604_v12 = vadd.f32 %v603_v25, %v1705_v63  ;;  %v872_v28 = vmul.f32 %v871_v19, %v1948_v7  ;;  %v894_v51 = vadd.f32 %v892_v10, %v876_v53 }
 0x147   :  { %v857_v54 = vadd.f32 %v855_v14, %v845_v47  ;;  %v2132_v57 = vstv %s1927_s17  ;;  %v970_v16 = vrot.slane %v956_v48, 1  ;;  %v974_v24 = vrot.slane %v960_v46, 1 }
 0x148   :  { %v958_v2 = vmul.f32 %v2132_v57, %v1951_v9  ;;  %v860_v39 = vstv %s1989_s3  ;;  %v890_v26 = vadd.f32 %v888_v33, %v872_v28  ;;  %v900_v42 = vrot.slane %v894_v51, 2 }
 0x149   :  { %v2133_v59 = vstv %s2131_s12  ;;  %v735_v52 = vadd.f32 %v734_v60, %v732_v6  ;;  %v858_v63 = vadd.f32 %v857_v54, %v1903_v13  ;;  %v859_v3 = vadd.f32 %v1901_v38, %v776_v40 }
 0x14a   :  { %v954_v18 = vmul.f32 %v2133_v59, %v1951_v9  ;;  %v976_v7 = vadd.f32 %v974_v24, %v958_v2  ;;  %v605_v19 = vadd.f32 %v1885_v62, %v522_v61  ;;  %v2134_v23 = vrot.slane %v1872_v35, 2 }
 0x14b   :  { %v902_v17 = vadd.f32 %v900_v42, %v890_v26  ;;  %v2135_v56 = vrot.slane %v1868_v31, 1  ;;  %v2136_v41 = vstv %s1865_s15  ;;  %v861_v29 = vadd.f32 %v860_v39, %v858_v63 }
 0x14c   :  { %v898_v20 = vadd.f32 %v2134_v23, %v1905_v58  ;;  %v607_v9 = vadd.f32 %v2136_v41, %v604_v12  ;;  %v972_v5 = vadd.f32 %v970_v16, %v954_v18  ;;  %v982_v13 = vrot.slane %v976_v7, 2 }
 0x14d   :  { %v964_v50 = vadd.f32 %v2135_v56, %v1897_v30  ;;  %v2137_v38 = vrot.slane %v1874_v36, 2  ;;  %v862_v32 = vadd.f32 %v861_v29, %v859_v3  ;;  %v944_v62 = vadd.f32 %v1919_v45, %v1910_v27 }
 0x14e   :  { %v903_v44 = vadd.f32 %v902_v17, %v898_v20  ;;  %v984_v35 = vadd.f32 %v982_v13, %v972_v5  ;;  %v991_v58 = vrot.slane %v735_v52, 7  ;;  %v987_v8 = vstv %s2011_s7 }
 0x14f   :  { %v980_v4 = vadd.f32 %v2137_v38, %v964_v50  ;;  %v608_v34 = vadd.f32 %v607_v9, %v605_v19  ;;  %v994_v30 = vrot.slane %v862_v32, 6 }
 0x150   :  { %v986_v31 = vadd.f32 %v944_v62, %v903_v44 }
 0x151   :  { %v985_v55 = vadd.f32 %v984_v35, %v980_v4  ;;  %v999_v22 = vsel %vm453_vm2, %v608_v34, %v991_v58 }
 0x152   :  { %v1000_v11 = vsel %vm455_vm3, %v999_v22, %v994_v30 }
 0x153   :  { %v988_v37 = vadd.f32 %v987_v8, %v985_v55 }
 0x155   :  { %v989_v21 = vadd.f32 %v988_v37, %v986_v31 }
 0x157   :  { %v997_v25 = vrot.slane %v989_v21, 5 }
 0x159   :  { %v1001_v36 = vsel %vm457_vm4, %v1000_v11, %v997_v25 }
 0x15a   :  { %v1002_v43 = vsel %vm459_vm5, %v1001_v36, %v608_v34 }
 0x15b   :  { %v1003_v27 = vsel %vm461_vm6, %v1002_v43, %v991_v58 }
 0x15c   :  { %v1004_v45 = vsel %vm463_vm7, %v1003_v27, %v994_v30 }
 0x15d   :  { %v1005_v15 = vsel %vm465_vm8, %v1004_v45, %v997_v25 }
 0x15e   :  { %v1007_v6 = vmin.f32 %v1005_v15, 0.0  ;;  %vm1006_vm10 = vcmp.gt.f32.partialorder %v1005_v15, 0.0 }
 0x160   :  { %v1008_v0 = vmul.f32 1.442695, %v1007_v6 }
 0x162   :  { %1179 = vpow2.f32 %v1008_v0 }
 0x168   :  { %v1180_v47 = vpop.eup %1179 }
 0x169   :  { %v1173_v49 = vadd.f32 -1.0, %v1180_v47 }
 0x16b   :  { %v1011_v53 = vsel %vm1006_vm10, %v1005_v15, %v1173_v49 }
 0x16c   :  { %v1012_v33 = vmul.f32 0.2, %v1011_v53 }
 0x16e   :  { %v1013_v10 = vadd.f32 %v1835_v1, %v1012_v33 }
 0x170   :  { %1015 = vst.msk [vmem:[%s2138_s23] sm:$0xff] %vm1014_vm11, %v1013_v10 }
 0x171   :  { %1020 = vsyncpa [#allocation3], 1 }

</bundles_post_ra>
